<compile_context>
chip_gen: v5e
topology: v5e:2x2
jax: 0.10.0
libtpu: 0.0.40
codegen_flags: <defaults>
</compile_context>

<pallas_src>
import functools

import jax
import jax.numpy as jnp
from jax import lax
from jax.experimental import pallas as pl
from jax.experimental.pallas import tpu as pltpu


def _round_up(v, m):
    return ((v + m - 1) // m) * m


def _label_histogram_kernel(x_ref, idx_ref, kt_ref, knorm_ref, m_ref, a_ref,
                            r_ref, s_ref, wt_ref, b_ref, o_ref, acc_ref,
                            *, gamma):
    i = pl.program_id(0)

    @pl.when(i == 0)
    def _():
        acc_ref[...] = jnp.zeros_like(acc_ref)

    x = x_ref[...]                                   # (TN, D) f32
    tn = x.shape[0]
    bp = acc_ref.shape[0]

    # squared Euclidean distance to all H*K cluster centers.
    # k is pre-transposed in the wrapper -> standard (TN,D)x(D,HK) MXU feed.
    x_norm = jnp.sum(x * x, axis=1, keepdims=True)                         # (TN, 1)
    xk = jnp.dot(x, kt_ref[...], preferred_element_type=jnp.float32)       # (TN, HK)
    dist = jnp.maximum(x_norm - 2.0 * xk + knorm_ref[...], 0.0)            # clamp: cancellation

    # Student-t kernel (1 + d/gamma)^(-(gamma+1)/2)
    if gamma == 1.0:
        # exponent is exactly -1 -> single approximate EUP reciprocal
        t = pl.reciprocal(1.0 + dist, approx=True)
    else:
        p = -(gamma + 1.0) / 2.0
        t = jnp.exp(p * jnp.log(1.0 + dist / gamma))

    # per-head normalization, tau scaling and head averaging as constant matmuls:
    #   s_head[n,(h,k)] = sum_k' t[n,(h,k')]        (block-diagonal ones matrix M)
    #   w_mean[n,k]     = (tau/H) * sum_h t/s_head  (column-selection matrix A)
    s_head = jnp.dot(t, m_ref[...], preferred_element_type=jnp.float32)    # (TN, HK)
    t_norm = t * pl.reciprocal(s_head, approx=True)
    w_mean = jnp.dot(t_norm, a_ref[...], preferred_element_type=jnp.float32)  # (TN, K)

    # softmax over clusters
    mx = jnp.max(w_mean, axis=1, keepdims=True)
    e = jnp.exp(w_mean - mx)
    w = e * pl.reciprocal(jnp.sum(e, axis=1, keepdims=True), approx=True)  # (TN, K)

    # new_x[n, k*D + d] = w[n,k] * x[n,d], lane-dense via bf16-fed replication matmuls;
    # elementwise product kept f32 (v5e has no bf16 VPU), cast once for the scatter.
    x_rep = jnp.dot(x.astype(jnp.bfloat16), r_ref[...],
                    preferred_element_type=jnp.float32)                    # (TN, KD)
    w_rep = jnp.dot(w.astype(jnp.bfloat16), s_ref[...],
                    preferred_element_type=jnp.float32)                    # (TN, KD)
    new_x = (x_rep * w_rep).astype(jnp.bfloat16)

    # one-hot scatter matrix (Bp, TN); padded rows carry idx == -1 -> all-zero column
    idx = idx_ref[...]                                                     # (1, TN) int32
    oh = (lax.broadcasted_iota(jnp.int32, (bp, tn), 0) == idx).astype(jnp.bfloat16)

    # scatter-sum as a canonical bf16 MXU matmul with f32 accumulation
    acc_ref[...] += jnp.dot(oh, new_x, preferred_element_type=jnp.float32)  # (Bp, KD)

    @pl.when(i == pl.num_programs(0) - 1)
    def _():
        # trans = Linear(K*D -> D) + LeakyReLU(0.01)
        z = jnp.dot(acc_ref[...], wt_ref[...],
                    preferred_element_type=jnp.float32) + b_ref[...]       # (Bp, D)
        o_ref[...] = jnp.where(z > 0, z, 0.01 * z).astype(o_ref.dtype)


def label_histogram_forward(x, k, index, W, b, batch_size,
                            *, gamma=1.0, tau=10.0, tile_n=2048):
    """x: (N, D) f32, k: (H, K, D), index: (N,) int in [0, batch_size), W: (D, K*D), b: (D,)."""
    N, D = x.shape
    H, K, _ = k.shape
    HK = H * K
    KD = K * D

    # sublane-pad the batch dimension of the accumulator / output
    B_pad = _round_up(max(int(batch_size), 1), 8)

    # tile over N; tile kept a multiple of 128 so the (1, tile) index stream is lane-dense
    tile = min(_round_up(tile_n, 128), _round_up(N, 128))
    N_pad = _round_up(N, tile)

    x_p = x.astype(jnp.float32)
    idx = index.astype(jnp.int32)      # any idx >= batch_size is silently dropped (matches ref)
    if N_pad != N:
        x_p = jnp.pad(x_p, ((0, N_pad - N), (0, 0)))
        idx = jnp.pad(idx, (0, N_pad - N), constant_values=-1)
    idx_row = idx[None, :]                                     # (1, N_pad) lane-dense stream

    # hoisted / constant resident inputs
    kmat = k.reshape(HK, D).astype(jnp.float32)
    kt = kmat.T                                                # (D, HK), pre-transposed
    knorm = jnp.sum(kmat * kmat, axis=1)[None, :]              # (1, HK)
    head_of = jnp.arange(HK) // K
    M = (head_of[:, None] == head_of[None, :]).astype(jnp.float32)                    # (HK, HK)
    A = (tau / H) * (jnp.arange(HK)[:, None] % K ==
                     jnp.arange(K)[None, :]).astype(jnp.float32)                      # (HK, K)
    R = (jnp.arange(KD)[None, :] % D ==
         jnp.arange(D)[:, None]).astype(jnp.bfloat16)                                 # (D, KD)
    S = (jnp.arange(KD)[None, :] // D ==
         jnp.arange(K)[:, None]).astype(jnp.bfloat16)                                 # (K, KD)
    wt = W.T.astype(jnp.float32)                               # (KD, D)
    b2 = b[None, :].astype(jnp.float32)                        # (1, D)

    kernel = functools.partial(_label_histogram_kernel, gamma=float(gamma))

    out = pl.pallas_call(
        kernel,
        out_shape=jax.ShapeDtypeStruct((B_pad, D), jnp.float32),
        grid_spec=pltpu.PrefetchScalarGridSpec(
            num_scalar_prefetch=0,
            grid=(N_pad // tile,),
            in_specs=[
                pl.BlockSpec((tile, D), lambda i: (i, 0)),     # x tile (streamed)
                pl.BlockSpec((1, tile), lambda i: (0, i)),     # index row (streamed)
                pl.BlockSpec((D, HK), lambda i: (0, 0)),       # k^T (resident)
                pl.BlockSpec((1, HK), lambda i: (0, 0)),       # ||k||^2 (resident)
                pl.BlockSpec((HK, HK), lambda i: (0, 0)),      # per-head sum matrix M
                pl.BlockSpec((HK, K), lambda i: (0, 0)),       # head-average matrix A
                pl.BlockSpec((D, KD), lambda i: (0, 0)),       # x replication matrix R (bf16)
                pl.BlockSpec((K, KD), lambda i: (0, 0)),       # w expansion matrix S (bf16)
                pl.BlockSpec((KD, D), lambda i: (0, 0)),       # W^T (resident)
                pl.BlockSpec((1, D), lambda i: (0, 0)),        # bias
            ],
            out_specs=pl.BlockSpec((B_pad, D), lambda i: (0, 0)),
            scratch_shapes=[pltpu.VMEM((B_pad, KD), jnp.float32)],
        ),
        compiler_params=pltpu.CompilerParams(
            dimension_semantics=("arbitrary",),
            vmem_limit_bytes=32 * 1024 * 1024,   # > v5e 16 MiB default, = v6e/v7x scoped default
        ),
    )(x_p, idx_row, kt, knorm, M, A, R, S, wt, b2)

    return out[:batch_size]


def _reference_forward(x, k, index, W, b, batch_size, gamma, tau):
    """Pure-JAX mirror of the PyTorch forward for verification."""
    H, K, D = k.shape
    N = x.shape[0]
    kflat = k.reshape(H * K, D)
    dist = jnp.sum((kflat[:, None, :] - x[None, :, :]) ** 2, axis=-1)     # (HK, N)
    dist = (1.0 + dist / gamma) ** (-(gamma + 1.0) / 2.0)
    dist = dist.reshape(H, K, N).transpose(2, 1, 0)                       # (N, K, H)
    w = dist / jnp.sum(dist, axis=-2, keepdims=True) * tau
    w = jax.nn.softmax(jnp.mean(w, axis=-1), axis=-1)                     # (N, K)
    new_x = (w[:, :, None] * x[:, None, :]).reshape(N, K * D)
    oh = (jnp.arange(batch_size)[:, None] == index[None, :]).astype(x.dtype)
    agg = oh @ new_x                                                      # scatter-sum
    z = agg @ W.T + b
    return jnp.where(z > 0, z, 0.01 * z)


def _run_case(seed, N, D, K, H, B, gamma=1.0, tau=10.0, tile_n=2048):
    key = jax.random.PRNGKey(seed)
    kx, ki, kk, kw, kb = jax.random.split(key, 5)

    x = jax.random.normal(kx, (N, D), dtype=jnp.float32)
    index = jax.random.randint(ki, (N,), 0, B, dtype=jnp.int32)

    # deterministic parameter init (mirrors xavier_uniform_ / Linear defaults)
    xav = (6.0 / (K * D + H * D)) ** 0.5
    k_param = jax.random.uniform(kk, (H, K, D), jnp.float32, -xav, xav)
    lin_bound = 1.0 / (K * D) ** 0.5
    W = jax.random.uniform(kw, (D, K * D), jnp.float32, -lin_bound, lin_bound)
    b = jax.random.uniform(kb, (D,), jnp.float32, -lin_bound, lin_bound)

    out = label_histogram_forward(x, k_param, index, W, b, B,
                                  gamma=gamma, tau=tau, tile_n=tile_n)
    out = jax.block_until_ready(out)

    ref = _reference_forward(x, k_param, index, W, b, B, gamma, tau)
    assert out.shape == (B, D)
    assert jnp.all(jnp.isfinite(out))
    assert jnp.allclose(out, ref, rtol=2e-2, atol=2e-2)


if __name__ == "__main__":
    # primary shapes from the module: in_size=32, num_cluster=8, heads=2
    _run_case(seed=0, N=64, D=32, K=8, H=2, B=4)
    # exercise padding / multi-tile paths: N not a tile multiple, B not a multiple of 8
    _run_case(seed=1, N=300, D=32, K=8, H=2, B=5, tile_n=128)
    print("KERNEL_OK")
</pallas_src>

<mosaic_0001>
module attributes {stable_mosaic.version = 11 : i64} {
  func.func @_label_histogram_kernel(%arg0: i32, %arg1: memref<128x32xf32, #tpu.memory_space<vmem>>, %arg2: memref<1x128xi32, #tpu.memory_space<vmem>>, %arg3: memref<32x16xf32, #tpu.memory_space<vmem>>, %arg4: memref<1x16xf32, #tpu.memory_space<vmem>>, %arg5: memref<16x16xf32, #tpu.memory_space<vmem>>, %arg6: memref<16x8xf32, #tpu.memory_space<vmem>>, %arg7: memref<32x256xbf16, #tpu.memory_space<vmem>>, %arg8: memref<8x256xbf16, #tpu.memory_space<vmem>>, %arg9: memref<256x32xf32, #tpu.memory_space<vmem>>, %arg10: memref<1x32xf32, #tpu.memory_space<vmem>>, %arg11: memref<8x32xf32, #tpu.memory_space<vmem>>, %arg12: memref<8x256xf32, #tpu.memory_space<vmem>>) attributes {dimension_semantics = [#tpu.dimension_semantics<arbitrary>], iteration_bounds = array<i64: 1>, scalar_prefetch = 0 : i64, scratch_operands = 1 : i64, tpu.core_type = #tpu.core_type<tc>, window_params = [{transform_indices = @transform_0, window_bounds = array<i64: 128, 32>}, {transform_indices = @transform_1, window_bounds = array<i64: 1, 128>}, {pipeline_mode = #tpu.pipeline_mode<synchronous>, transform_indices = @transform_2, window_bounds = array<i64: 32, 16>}, {pipeline_mode = #tpu.pipeline_mode<synchronous>, transform_indices = @transform_3, window_bounds = array<i64: 1, 16>}, {pipeline_mode = #tpu.pipeline_mode<synchronous>, transform_indices = @transform_4, window_bounds = array<i64: 16, 16>}, {pipeline_mode = #tpu.pipeline_mode<synchronous>, transform_indices = @transform_5, window_bounds = array<i64: 16, 8>}, {pipeline_mode = #tpu.pipeline_mode<synchronous>, transform_indices = @transform_6, window_bounds = array<i64: 32, 256>}, {pipeline_mode = #tpu.pipeline_mode<synchronous>, transform_indices = @transform_7, window_bounds = array<i64: 8, 256>}, {pipeline_mode = #tpu.pipeline_mode<synchronous>, transform_indices = @transform_8, window_bounds = array<i64: 256, 32>}, {pipeline_mode = #tpu.pipeline_mode<synchronous>, transform_indices = @transform_9, window_bounds = array<i64: 1, 32>}, {pipeline_mode = #tpu.pipeline_mode<synchronous>, transform_indices = @transform_10, window_bounds = array<i64: 8, 32>}]} {
    %c0_i32 = arith.constant 0 : i32
    %0 = arith.cmpi eq, %arg0, %c0_i32 : i32
    %1 = arith.extui %0 : i1 to i32
    %c0_i32_0 = arith.constant 0 : i32
    %2 = arith.cmpi ne, %1, %c0_i32_0 : i32
    scf.if %2 {
      %cst_33 = arith.constant 0.000000e+00 : f32
      %59 = vector.broadcast %cst_33 : f32 to vector<8x256xf32>
      %c0_34 = arith.constant 0 : index
      %c0_35 = arith.constant 0 : index
      %60 = vector.load %arg12[%c0_34, %c0_35] : memref<8x256xf32, #tpu.memory_space<vmem>>, vector<8x256xf32>
      tpu.vector_store %arg12[%c0_34, %c0_35], %59 {strides = array<i32>} : memref<8x256xf32, #tpu.memory_space<vmem>>, vector<8x256xf32>,
    } else {
    }
    %c0 = arith.constant 0 : index
    %c0_1 = arith.constant 0 : index
    %3 = vector.load %arg1[%c0, %c0_1] : memref<128x32xf32, #tpu.memory_space<vmem>>, vector<128x32xf32>
    %4 = arith.mulf %3, %3 : vector<128x32xf32>
    %cst = arith.constant dense<0.000000e+00> : vector<128xf32>
    %5 = vector.multi_reduction <add>, %4, %cst [1] : vector<128x32xf32> to vector<128xf32>
    %6 = vector.shape_cast %5 : vector<128xf32> to vector<128x1xf32>
    %c0_2 = arith.constant 0 : index
    %c0_3 = arith.constant 0 : index
    %7 = vector.load %arg3[%c0_2, %c0_3] : memref<32x16xf32, #tpu.memory_space<vmem>>, vector<32x16xf32>
    %cst_4 = arith.constant dense<0.000000e+00> : vector<128x16xf32>
    %8 = tpu.matmul %3, %7, %cst_4 {dimension_numbers = #tpu.dot_dimension_numbers<[1], [0], [0], [1], [0, 0, 1, 1], [], []>} : vector<128x32xf32>, vector<32x16xf32>, vector<128x16xf32> -> vector<128x16xf32>
    %cst_5 = arith.constant 2.000000e+00 : f32
    %9 = vector.broadcast %cst_5 : f32 to vector<128x16xf32>
    %10 = arith.mulf %9, %8 : vector<128x16xf32>
    %11 = vector.broadcast %6 : vector<128x1xf32> to vector<128x16xf32>
    %12 = arith.subf %11, %10 : vector<128x16xf32>
    %c0_6 = arith.constant 0 : index
    %c0_7 = arith.constant 0 : index
    %13 = vector.load %arg4[%c0_6, %c0_7] : memref<1x16xf32, #tpu.memory_space<vmem>>, vector<1x16xf32>
    %14 = vector.broadcast %13 : vector<1x16xf32> to vector<128x16xf32>
    %15 = arith.addf %12, %14 : vector<128x16xf32>
    %cst_8 = arith.constant 0.000000e+00 : f32
    %16 = vector.broadcast %cst_8 : f32 to vector<128x16xf32>
    %17 = arith.maximumf %15, %16 : vector<128x16xf32>
    %cst_9 = arith.constant 1.000000e+00 : f32
    %18 = vector.broadcast %cst_9 : f32 to vector<128x16xf32>
    %19 = arith.addf %18, %17 : vector<128x16xf32>
    %20 = tpu.reciprocal %19 {approx = true} : vector<128x16xf32> -> vector<128x16xf32>
    %c0_10 = arith.constant 0 : index
    %c0_11 = arith.constant 0 : index
    %21 = vector.load %arg5[%c0_10, %c0_11] : memref<16x16xf32, #tpu.memory_space<vmem>>, vector<16x16xf32>
    %cst_12 = arith.constant dense<0.000000e+00> : vector<128x16xf32>
    %22 = tpu.matmul %20, %21, %cst_12 {dimension_numbers = #tpu.dot_dimension_numbers<[1], [0], [0], [1], [0, 0, 1, 1], [], []>} : vector<128x16xf32>, vector<16x16xf32>, vector<128x16xf32> -> vector<128x16xf32>
    %23 = tpu.reciprocal %22 {approx = true} : vector<128x16xf32> -> vector<128x16xf32>
    %24 = arith.mulf %20, %23 : vector<128x16xf32>
    %c0_13 = arith.constant 0 : index
    %c0_14 = arith.constant 0 : index
    %25 = vector.load %arg6[%c0_13, %c0_14] : memref<16x8xf32, #tpu.memory_space<vmem>>, vector<16x8xf32>
    %cst_15 = arith.constant dense<0.000000e+00> : vector<128x8xf32>
    %26 = tpu.matmul %24, %25, %cst_15 {dimension_numbers = #tpu.dot_dimension_numbers<[1], [0], [0], [1], [0, 0, 1, 1], [], []>} : vector<128x16xf32>, vector<16x8xf32>, vector<128x8xf32> -> vector<128x8xf32>
    %cst_16 = arith.constant dense<0xFF800000> : vector<128xf32>
    %27 = vector.multi_reduction <maximumf>, %26, %cst_16 [1] : vector<128x8xf32> to vector<128xf32>
    %28 = vector.shape_cast %27 : vector<128xf32> to vector<128x1xf32>
    %29 = vector.broadcast %28 : vector<128x1xf32> to vector<128x8xf32>
    %30 = arith.subf %26, %29 : vector<128x8xf32>
    %31 = math.exp %30 : vector<128x8xf32>
    %cst_17 = arith.constant dense<0.000000e+00> : vector<128xf32>
    %32 = vector.multi_reduction <add>, %31, %cst_17 [1] : vector<128x8xf32> to vector<128xf32>
    %33 = vector.shape_cast %32 : vector<128xf32> to vector<128x1xf32>
    %34 = tpu.reciprocal %33 {approx = true} : vector<128x1xf32> -> vector<128x1xf32>
    %35 = vector.broadcast %34 : vector<128x1xf32> to vector<128x8xf32>
    %36 = arith.mulf %31, %35 : vector<128x8xf32>
    %37 = arith.truncf %3 : vector<128x32xf32> to vector<128x32xbf16>
    %c0_18 = arith.constant 0 : index
    %c0_19 = arith.constant 0 : index
    %38 = vector.load %arg7[%c0_18, %c0_19] : memref<32x256xbf16, #tpu.memory_space<vmem>>, vector<32x256xbf16>
    %cst_20 = arith.constant dense<0.000000e+00> : vector<128x256xf32>
    %39 = tpu.matmul %37, %38, %cst_20 {dimension_numbers = #tpu.dot_dimension_numbers<[1], [0], [0], [1], [0, 0, 1, 1], [], []>} : vector<128x32xbf16>, vector<32x256xbf16>, vector<128x256xf32> -> vector<128x256xf32>
    %40 = arith.truncf %36 : vector<128x8xf32> to vector<128x8xbf16>
    %c0_21 = arith.constant 0 : index
    %c0_22 = arith.constant 0 : index
    %41 = vector.load %arg8[%c0_21, %c0_22] : memref<8x256xbf16, #tpu.memory_space<vmem>>, vector<8x256xbf16>
    %cst_23 = arith.constant dense<0.000000e+00> : vector<128x256xf32>
    %42 = tpu.matmul %40, %41, %cst_23 {dimension_numbers = #tpu.dot_dimension_numbers<[1], [0], [0], [1], [0, 0, 1, 1], [], []>} : vector<128x8xbf16>, vector<8x256xbf16>, vector<128x256xf32> -> vector<128x256xf32>
    %43 = arith.mulf %39, %42 : vector<128x256xf32>
    %44 = arith.truncf %43 : vector<128x256xf32> to vector<128x256xbf16>
    %c0_24 = arith.constant 0 : index
    %c0_25 = arith.constant 0 : index
    %45 = vector.load %arg2[%c0_24, %c0_25] : memref<1x128xi32, #tpu.memory_space<vmem>>, vector<1x128xi32>
    %46 = tpu.iota {dimensions = array<i32: 0>} : vector<8x128xi32>
    %47 = vector.broadcast %45 : vector<1x128xi32> to vector<8x128xi32>
    %48 = arith.cmpi eq, %46, %47 : vector<8x128xi32>
    %49 = arith.extui %48 : vector<8x128xi1> to vector<8x128xi32>
    %50 = arith.sitofp %49 : vector<8x128xi32> to vector<8x128xf32>
    %51 = arith.truncf %50 : vector<8x128xf32> to vector<8x128xbf16>
    %c0_26 = arith.constant 0 : index
    %c0_27 = arith.constant 0 : index
    %52 = vector.load %arg12[%c0_26, %c0_27] : memref<8x256xf32, #tpu.memory_space<vmem>>, vector<8x256xf32>
    %cst_28 = arith.constant dense<0.000000e+00> : vector<8x256xf32>
    %53 = tpu.matmul %51, %44, %cst_28 {dimension_numbers = #tpu.dot_dimension_numbers<[1], [0], [0], [1], [0, 0, 1, 1], [], []>} : vector<8x128xbf16>, vector<128x256xbf16>, vector<8x256xf32> -> vector<8x256xf32>
    %54 = arith.addf %52, %53 : vector<8x256xf32>
    %c0_29 = arith.constant 0 : index
    %c0_30 = arith.constant 0 : index
    %55 = vector.load %arg12[%c0_29, %c0_30] : memref<8x256xf32, #tpu.memory_space<vmem>>, vector<8x256xf32>
    tpu.vector_store %arg12[%c0_29, %c0_30], %54 {strides = array<i32>} : memref<8x256xf32, #tpu.memory_space<vmem>>, vector<8x256xf32>,
    %c0_i32_31 = arith.constant 0 : i32
    %56 = arith.cmpi eq, %arg0, %c0_i32_31 : i32
    %57 = arith.extui %56 : i1 to i32
    %c0_i32_32 = arith.constant 0 : i32
    %58 = arith.cmpi ne, %57, %c0_i32_32 : i32
    scf.if %58 {
      %c0_33 = arith.constant 0 : index
      %c0_34 = arith.constant 0 : index
      %59 = vector.load %arg12[%c0_33, %c0_34] : memref<8x256xf32, #tpu.memory_space<vmem>>, vector<8x256xf32>
      %c0_35 = arith.constant 0 : index
      %c0_36 = arith.constant 0 : index
      %60 = vector.load %arg9[%c0_35, %c0_36] : memref<256x32xf32, #tpu.memory_space<vmem>>, vector<256x32xf32>
      %cst_37 = arith.constant dense<0.000000e+00> : vector<8x32xf32>
      %61 = tpu.matmul %59, %60, %cst_37 {dimension_numbers = #tpu.dot_dimension_numbers<[1], [0], [0], [1], [0, 0, 1, 1], [], []>} : vector<8x256xf32>, vector<256x32xf32>, vector<8x32xf32> -> vector<8x32xf32>
      %c0_38 = arith.constant 0 : index
      %c0_39 = arith.constant 0 : index
      %62 = vector.load %arg10[%c0_38, %c0_39] : memref<1x32xf32, #tpu.memory_space<vmem>>, vector<1x32xf32>
      %63 = vector.broadcast %62 : vector<1x32xf32> to vector<8x32xf32>
      %64 = arith.addf %61, %63 : vector<8x32xf32>
      %cst_40 = arith.constant 0.000000e+00 : f32
      %65 = vector.broadcast %cst_40 : f32 to vector<8x32xf32>
      %66 = arith.cmpf ogt, %64, %65 : vector<8x32xf32>
      %cst_41 = arith.constant 0.00999999977 : f32
      %67 = vector.broadcast %cst_41 : f32 to vector<8x32xf32>
      %68 = arith.mulf %67, %64 : vector<8x32xf32>
      %69 = arith.select %66, %64, %68 : vector<8x32xi1>, vector<8x32xf32>
      %c0_42 = arith.constant 0 : index
      %c0_43 = arith.constant 0 : index
      %70 = vector.load %arg11[%c0_42, %c0_43] : memref<8x32xf32, #tpu.memory_space<vmem>>, vector<8x32xf32>
      tpu.vector_store %arg11[%c0_42, %c0_43], %69 {strides = array<i32>} : memref<8x32xf32, #tpu.memory_space<vmem>>, vector<8x32xf32>,
    } else {
    }
    return
  }
  func.func @transform_0(%arg0: i32) -> (i32, i32) {
    %c0_i32 = arith.constant 0 : i32
    %c0_i32_0 = arith.constant 0 : i32
    return %arg0, %c0_i32 : i32, i32
  }
  func.func @transform_1(%arg0: i32) -> (i32, i32) {
    %c0_i32 = arith.constant 0 : i32
    %c0_i32_0 = arith.constant 0 : i32
    return %c0_i32, %arg0 : i32, i32
  }
  func.func @transform_2(%arg0: i32) -> (i32, i32) {
    %c0_i32 = arith.constant 0 : i32
    %c0_i32_0 = arith.constant 0 : i32
    %c0_i32_1 = arith.constant 0 : i32
    return %c0_i32, %c0_i32_0 : i32, i32
  }
  func.func @transform_3(%arg0: i32) -> (i32, i32) {
    %c0_i32 = arith.constant 0 : i32
    %c0_i32_0 = arith.constant 0 : i32
    %c0_i32_1 = arith.constant 0 : i32
    return %c0_i32, %c0_i32_0 : i32, i32
  }
  func.func @transform_4(%arg0: i32) -> (i32, i32) {
    %c0_i32 = arith.constant 0 : i32
    %c0_i32_0 = arith.constant 0 : i32
    %c0_i32_1 = arith.constant 0 : i32
    return %c0_i32, %c0_i32_0 : i32, i32
  }
  func.func @transform_5(%arg0: i32) -> (i32, i32) {
    %c0_i32 = arith.constant 0 : i32
    %c0_i32_0 = arith.constant 0 : i32
    %c0_i32_1 = arith.constant 0 : i32
    return %c0_i32, %c0_i32_0 : i32, i32
  }
  func.func @transform_6(%arg0: i32) -> (i32, i32) {
    %c0_i32 = arith.constant 0 : i32
    %c0_i32_0 = arith.constant 0 : i32
    %c0_i32_1 = arith.constant 0 : i32
    return %c0_i32, %c0_i32_0 : i32, i32
  }
  func.func @transform_7(%arg0: i32) -> (i32, i32) {
    %c0_i32 = arith.constant 0 : i32
    %c0_i32_0 = arith.constant 0 : i32
    %c0_i32_1 = arith.constant 0 : i32
    return %c0_i32, %c0_i32_0 : i32, i32
  }
  func.func @transform_8(%arg0: i32) -> (i32, i32) {
    %c0_i32 = arith.constant 0 : i32
    %c0_i32_0 = arith.constant 0 : i32
    %c0_i32_1 = arith.constant 0 : i32
    return %c0_i32, %c0_i32_0 : i32, i32
  }
  func.func @transform_9(%arg0: i32) -> (i32, i32) {
    %c0_i32 = arith.constant 0 : i32
    %c0_i32_0 = arith.constant 0 : i32
    %c0_i32_1 = arith.constant 0 : i32
    return %c0_i32, %c0_i32_0 : i32, i32
  }
  func.func @transform_10(%arg0: i32) -> (i32, i32) {
    %c0_i32 = arith.constant 0 : i32
    %c0_i32_0 = arith.constant 0 : i32
    %c0_i32_1 = arith.constant 0 : i32
    return %c0_i32, %c0_i32_0 : i32, i32
  }
}

</mosaic_0001>

<bundles_post_ra>
// kernel: tpu_custom_call.1
= control target key start
LH: loop header
LB: loop body
LE: loop exit
PB: predicated region body
PF: predicated region fallthrough
CT: control target
= control target key end

     0   :  { %vm75_vm0 = vcmask 261120   ;;  %s2260_s0 = inlined_call_operand.vmem [shape: f32[128,32], index: 0, kind: input, shape index: {}]   ;;  %s2261_s1 = inlined_call_operand.vmem [shape: s32[1,128], index: 1, kind: input, shape index: {}]   ;;  %s2262_s2 = inlined_call_operand.vmem [shape: f32[32,16], index: 2, kind: input, shape index: {}]   ;;  %s2263_s3 = inlined_call_operand.vmem [shape: f32[1,16], index: 3, kind: input, shape index: {}]   ;;  %s2264_s4 = inlined_call_operand.vmem [shape: f32[16,16], index: 4, kind: input, shape index: {}]   ;;  %s2265_s5 = inlined_call_operand.vmem [shape: f32[16,8], index: 5, kind: input, shape index: {}]   ;;  %s2266_s6 = inlined_call_operand.vmem [shape: bf16[32,256], index: 6, kind: input, shape index: {}]   ;;  %s2267_s7 = inlined_call_operand.vmem [shape: bf16[8,256], index: 7, kind: input, shape index: {}]   ;;  %s2268_s8 = inlined_call_operand.vmem [shape: f32[256,32], index: 8, kind: input, shape index: {}]   ;;  %s2269_s9 = inlined_call_operand.vmem [shape: f32[1,32], index: 9, kind: input, shape index: {}]   ;;  %s2270_s10 = inlined_call_operand.hbm [shape: f32[8,32], index: 10, kind: output, shape index: {}]  }
   0x1   :  { %v127_v0 = vld [vmem:[%s2262_s2 + $0x18] sm:$0xff]  ;;  %v126_v1 = vld [vmem:[%s2262_s2 + $0x10] sm:$0xff]  ;;  %v43_v2 = vld [vmem:[%s2260_s0] sm:$0xff] }
   0x2   :  { %188 = vmatpush.msra.mxu0 %v127_v0  ;;  %v44_v3 = vld [vmem:[%s2260_s0 + $0x8] sm:$0xff]  ;;  %1372 = vmatpush.msra.mxu3 %v127_v0  ;;  %v59_v6 = vmul.f32 %v43_v2, %v43_v2  ;;  %v1620_v7 = vld [vmem:[%s2260_s0 + $0x10] sm:$0xff]  ;;  %v124_v9 = vld [vmem:[%s2262_s2] sm:$0xff] }
   0x3   :  { %v125_v4 = vld [vmem:[%s2262_s2 + $0x8] sm:$0xff]  ;;  %v1615_v5 = vpack.c.bf16 %v44_v3, %v43_v2  ;;  %v61_v8 = vmul.f32 %v1620_v7, %v1620_v7 }
   0x4   :  { %189 = vmatpush.msra.mxu0 %v126_v1  ;;  %1373 = vmatpush.msra.mxu3 %v126_v1  ;;  %v76_v10 = vsel %vm75_vm0, %v59_v6, 0.0 }
   0x5   :  { %15 = vsyncpa [#allocation4], 0  ;;  %77 = vadd.xlane.f32.xlu0 %v76_v10  ;;  %v82_v11 = vsel %vm75_vm0, %v61_v8, 0.0  ;;  %v60_v12 = vmul.f32 %v44_v3, %v44_v3  ;;  %v1632_v13 = vld [vmem:[%s2260_s0 + $0x18] sm:$0xff]  ;;  %v1642_v17 = vld [vmem:[%s2260_s0 + $0x20] sm:$0xff]  ;;  %vm343_vm1 = vcmask 130048  }
   0x6   :  { %190 = vmatpush.msra.mxu0 %v125_v4  ;;  %83 = vadd.xlane.f32.xlu1 %v82_v11  ;;  %v62_v14 = vmul.f32 %v1632_v13, %v1632_v13  ;;  %v63_v18 = vmul.f32 %v1642_v17, %v1642_v17  ;;  %v1651_v20 = vld [vmem:[%s2260_s0 + $0x28] sm:$0xff]  ;;  %v1661_v23 = vld [vmem:[%s2260_s0 + $0x30] sm:$0xff]  ;;  %v1671_v26 = vld [vmem:[%s2260_s0 + $0x38] sm:$0xff]  ;;  %vm604_vm2 = vcmask 64512   ;;  %vm973_vm3 = vcmask 1043456  }
   0x7   :  { %1374 = vmatpush.msra.mxu3 %v125_v4  ;;  %v79_v15 = vsel %vm75_vm0, %v60_v12, 0.0  ;;  %v64_v21 = vmul.f32 %v1651_v20, %v1651_v20  ;;  %v65_v24 = vmul.f32 %v1661_v23, %v1661_v23  ;;  %v66_v27 = vmul.f32 %v1671_v26, %v1671_v26  ;;  %v51_v29 = vld [vmem:[%s2260_s0 + $0x40] sm:$0xff]  ;;  %v52_v32 = vld [vmem:[%s2260_s0 + $0x48] sm:$0xff]  ;;  %v53_v35 = vld [vmem:[%s2260_s0 + $0x50] sm:$0xff] }
   0x8   :  { %191 = vmatpush.msra.mxu0 %v124_v9  ;;  %v85_v16 = vsel %vm75_vm0, %v62_v14, 0.0  ;;  %v88_v19 = vsel %vm75_vm0, %v63_v18, 0.0  ;;  %v67_v30 = vmul.f32 %v51_v29, %v51_v29  ;;  %v68_v33 = vmul.f32 %v52_v32, %v52_v32  ;;  %v54_v38 = vld [vmem:[%s2260_s0 + $0x58] sm:$0xff]  ;;  %v55_v41 = vld [vmem:[%s2260_s0 + $0x60] sm:$0xff]  ;;  %v56_v44 = vld [vmem:[%s2260_s0 + $0x68] sm:$0xff] }
   0x9   :  { %1267 = vmatmul.msk.f32.vlgmr.msra.gmra.mxu0 %vm75_vm0, %v43_v2  ;;  %1375 = vmatpush.msra.mxu3 %v124_v9  ;;  %v91_v22 = vsel %vm75_vm0, %v64_v21, 0.0  ;;  %v94_v25 = vsel %vm75_vm0, %v65_v24, 0.0  ;;  %v97_v28 = vsel %vm75_vm0, %v66_v27, 0.0  ;;  %v69_v36 = vmul.f32 %v53_v35, %v53_v35  ;;  %v57_v45 = vld [vmem:[%s2260_s0 + $0x70] sm:$0xff]  ;;  %v58_v46 = vld [vmem:[%s2260_s0 + $0x78] sm:$0xff]  ;;  %v342_v53 = vld [vmem:[%s2264_s4 + $0x8] sm:$0xff] }
   0xa   :  { %89 = vadd.xlane.f32.xlu2 %v88_v19  ;;  %v100_v31 = vsel %vm75_vm0, %v67_v30, 0.0  ;;  %v103_v34 = vsel %vm75_vm0, %v68_v33, 0.0  ;;  %v70_v39 = vmul.f32 %v54_v38, %v54_v38  ;;  %v71_v42 = vmul.f32 %v55_v41, %v55_v41  ;;  %1282 = vmatmul.msk.f32.vlgmr.msra.gmra.mxu3 %vm75_vm0, %v58_v46  ;;  %v341_v54 = vld [vmem:[%s2264_s4] sm:$0xff] }
   0xb   :  { %v106_v37 = vsel %vm75_vm0, %v69_v36, 0.0  ;;  %v72_v47 = vmul.f32 %v56_v44, %v56_v44  ;;  %v73_v48 = vmul.f32 %v57_v45, %v57_v45  ;;  %v74_v51 = vmul.f32 %v58_v46, %v58_v46  ;;  %406 = vmatpush.msra.mxu1 %v342_v53  ;;  %v1733_v58 = vld [vmem:[%s2263_s3] ss:$0 sm:$0xff] }
   0xc   :  { %v109_v40 = vsel %vm75_vm0, %v70_v39, 0.0  ;;  %v112_v43 = vsel %vm75_vm0, %v71_v42, 0.0 }
   0xd   :  { %80 = vadd.xlane.f32.xlu0 %v79_v15  ;;  %v115_v49 = vsel %vm75_vm0, %v72_v47, 0.0  ;;  %v118_v50 = vsel %vm75_vm0, %v73_v48, 0.0  ;;  %v121_v52 = vsel %vm75_vm0, %v74_v51, 0.0  ;;  %407 = vmatpush.msra.mxu1 %v341_v54 }
   0xe   :  { %86 = vadd.xlane.f32.xlu1 %v85_v16 }
  0x11   :  { %1268 = vmatmul.msk.f32.gmra.mxu0 %vm75_vm0, %v44_v3 }
  0x12   :  { %92 = vadd.xlane.f32.xlu2 %v91_v22 }
  0x15   :  { %95 = vadd.xlane.f32.xlu0 %v94_v25 }
  0x16   :  { %98 = vadd.xlane.f32.xlu1 %v97_v28 }
  0x19   :  { %1269 = vmatmul.msk.f32.gmra.mxu0 %vm75_vm0, %v1620_v7 }
  0x1a   :  { %101 = vadd.xlane.f32.xlu2 %v100_v31 }
  0x1d   :  { %104 = vadd.xlane.f32.xlu0 %v103_v34 }
  0x1e   :  { %107 = vadd.xlane.f32.xlu1 %v106_v37 }
  0x21   :  { %1270 = vmatmul.msk.f32.gmra.mxu0 %vm75_vm0, %v1632_v13 }
  0x22   :  { %110 = vadd.xlane.f32.xlu2 %v109_v40 }
  0x25   :  { %113 = vadd.xlane.f32.xlu0 %v112_v43 }
  0x26   :  { %116 = vadd.xlane.f32.xlu1 %v115_v49 }
  0x29   :  { %1271 = vmatmul.msk.f32.gmra.mxu0 %vm75_vm0, %v1642_v17 }
  0x2a   :  { %119 = vadd.xlane.f32.xlu2 %v118_v50 }
  0x2d   :  { %122 = vadd.xlane.f32.xlu0 %v121_v52 }
  0x31   :  { %1272 = vmatmul.msk.f32.gmra.mxu0 %vm75_vm0, %v1651_v20 }
  0x39   :  { %1273 = vmatmul.msk.f32.gmra.mxu0 %vm75_vm0, %v1661_v23 }
  0x41   :  { %1274 = vmatmul.msk.f32.gmra.mxu0 %vm75_vm0, %v1671_v26 }
  0x49   :  { %1275 = vmatmul.msk.f32.gmra.mxu0 %vm75_vm0, %v51_v29 }
  0x51   :  { %1276 = vmatmul.msk.f32.gmra.mxu0 %vm75_vm0, %v52_v32 }
  0x59   :  { %1277 = vmatmul.msk.f32.gmra.mxu0 %vm75_vm0, %v53_v35 }
  0x61   :  { %1278 = vmatmul.msk.f32.gmra.mxu0 %vm75_vm0, %v54_v38 }
  0x69   :  { %1279 = vmatmul.msk.f32.gmra.mxu0 %vm75_vm0, %v55_v41 }
  0x71   :  { %1280 = vmatmul.msk.f32.gmra.mxu0 %vm75_vm0, %v56_v44 }
  0x78   :  { %v78_v55 = vpop.xlane.xlu0 %77 }
  0x79   :  { %1281 = vmatmul.msk.f32.gmra.mxu0 %vm75_vm0, %v57_v45  ;;  %v84_v4 = vpop.xlane.xlu1 %83 }
  0x7d   :  { %v90_v27 = vpop.xlane.xlu2 %89 }
  0x80   :  { %v81_v63 = vpop.xlane.xlu0 %80 }
  0x81   :  { %v87_v18 = vpop.xlane.xlu1 %86 }
  0x85   :  { %v93_v37 = vpop.xlane.xlu2 %92 }
  0x86   :  { %v193_v56 = vpop.f32.mrf.mxu0 }
  0x87   :  { %v241_v57 = vmul.f32 2.0, %v193_v56 }
  0x88   :  { %v96_v45 = vpop.xlane.xlu0 %95 }
  0x89   :  { %v257_v59 = vsub.f32 %v78_v55, %v241_v57  ;;  %v99_v53 = vpop.xlane.xlu1 %98 }
  0x8b   :  { %v277_v60 = vadd.f32 %v1733_v58, %v257_v59 }
  0x8d   :  { %v293_v61 = vmax.f32 %v277_v60, 0.0 }
  0x8e   :  { %v196_v62 = vpop.f32.mrf.mxu0 }
  0x8f   :  { %v309_v0 = vadd.f32 1.0, %v293_v61  ;;  %v242_v1 = vmul.f32 2.0, %v196_v62  ;;  %v102_v62 = vpop.xlane.xlu2 %101 }
  0x91   :  { %1381 = vrcp.f32 %v309_v0  ;;  %v258_v2 = vsub.f32 %v81_v63, %v242_v1 }
  0x93   :  { %v278_v3 = vadd.f32 %v1733_v58, %v258_v2 }
  0x95   :  { %v294_v6 = vmax.f32 %v278_v3, 0.0 }
  0x96   :  { %v199_v8 = vpop.f32.mrf.mxu0 }
  0x97   :  { %v1737_v9 = vpop.eup %1381  ;;  %v310_v10 = vadd.f32 1.0, %v294_v6  ;;  %v243_v11 = vmul.f32 2.0, %v199_v8  ;;  %v105_v8 = vpop.xlane.xlu0 %104 }
  0x98   :  { %1283 = vmatmul.msk.f32.vlgmr.msra.gmra.mxu1 %vm343_vm1, %v1737_v9 }
  0x99   :  { %1383 = vrcp.f32 %v310_v10  ;;  %v259_v12 = vsub.f32 %v84_v4, %v243_v11 }
  0x9b   :  { %v279_v14 = vadd.f32 %v1733_v58, %v259_v12 }
  0x9d   :  { %v295_v15 = vmax.f32 %v279_v14, 0.0 }
  0x9e   :  { %v202_v16 = vpop.f32.mrf.mxu0 }
  0x9f   :  { %v1742_v19 = vpop.eup %1383  ;;  %v311_v21 = vadd.f32 1.0, %v295_v15  ;;  %v244_v22 = vmul.f32 2.0, %v202_v16 }
  0xa0   :  { %1284 = vmatmul.msk.f32.gmra.mxu1 %vm343_vm1, %v1742_v19 }
  0xa1   :  { %1385 = vrcp.f32 %v311_v21  ;;  %v260_v24 = vsub.f32 %v87_v18, %v244_v22  ;;  %v108_v21 = vpop.xlane.xlu1 %107 }
  0xa3   :  { %v280_v25 = vadd.f32 %v1733_v58, %v260_v24 }
  0xa5   :  { %v296_v28 = vmax.f32 %v280_v25, 0.0 }
  0xa6   :  { %v205_v29 = vpop.f32.mrf.mxu0 }
  0xa7   :  { %v1747_v30 = vpop.eup %1385  ;;  %v312_v31 = vadd.f32 1.0, %v296_v28  ;;  %v245_v32 = vmul.f32 2.0, %v205_v29 }
  0xa8   :  { %1285 = vmatmul.msk.f32.gmra.mxu1 %vm343_vm1, %v1747_v30 }
  0xa9   :  { %1387 = vrcp.f32 %v312_v31  ;;  %v261_v33 = vsub.f32 %v90_v27, %v245_v32  ;;  %v111_v32 = vpop.xlane.xlu2 %110 }
  0xab   :  { %v281_v34 = vadd.f32 %v1733_v58, %v261_v33 }
  0xad   :  { %v297_v35 = vmax.f32 %v281_v34, 0.0 }
  0xae   :  { %v208_v36 = vpop.f32.mrf.mxu0 }
  0xaf   :  { %v1752_v38 = vpop.eup %1387  ;;  %v313_v39 = vadd.f32 1.0, %v297_v35  ;;  %v246_v40 = vmul.f32 2.0, %v208_v36 }
  0xb0   :  { %1286 = vmatmul.msk.f32.gmra.mxu1 %vm343_vm1, %v1752_v38 }
  0xb1   :  { %1389 = vrcp.f32 %v313_v39  ;;  %v262_v41 = vsub.f32 %v93_v37, %v246_v40 }
  0xb3   :  { %v282_v42 = vadd.f32 %v1733_v58, %v262_v41  ;;  %v114_v41 = vpop.xlane.xlu0 %113 }
  0xb5   :  { %v298_v43 = vmax.f32 %v282_v42, 0.0 }
  0xb6   :  { %v211_v44 = vpop.f32.mrf.mxu0 }
  0xb7   :  { %v1757_v46 = vpop.eup %1389  ;;  %v314_v47 = vadd.f32 1.0, %v298_v43  ;;  %v247_v48 = vmul.f32 2.0, %v211_v44 }
  0xb8   :  { %1287 = vmatmul.msk.f32.gmra.mxu1 %vm343_vm1, %v1757_v46 }
  0xb9   :  { %1391 = vrcp.f32 %v314_v47  ;;  %v263_v49 = vsub.f32 %v96_v45, %v247_v48 }
  0xbb   :  { %v283_v50 = vadd.f32 %v1733_v58, %v263_v49 }
  0xbd   :  { %v299_v51 = vmax.f32 %v283_v50, 0.0  ;;  %v117_v50 = vpop.xlane.xlu1 %116 }
  0xbe   :  { %v214_v52 = vpop.f32.mrf.mxu0 }
  0xbf   :  { %v1762_v54 = vpop.eup %1391  ;;  %v315_v55 = vadd.f32 1.0, %v299_v51  ;;  %v248_v56 = vmul.f32 2.0, %v214_v52 }
  0xc0   :  { %1288 = vmatmul.msk.f32.gmra.mxu1 %vm343_vm1, %v1762_v54 }
  0xc1   :  { %1393 = vrcp.f32 %v315_v55  ;;  %v264_v57 = vsub.f32 %v99_v53, %v248_v56  ;;  %v238_v55 = vpop.f32.mrf.mxu3 }
  0xc3   :  { %v284_v59 = vadd.f32 %v1733_v58, %v264_v57 }
  0xc5   :  { %v300_v60 = vmax.f32 %v284_v59, 0.0  ;;  %v256_v59 = vmul.f32 2.0, %v238_v55 }
  0xc6   :  { %v217_v61 = vpop.f32.mrf.mxu0 }
  0xc7   :  { %v1767_v63 = vpop.eup %1393  ;;  %v316_v0 = vadd.f32 1.0, %v300_v60  ;;  %v249_v1 = vmul.f32 2.0, %v217_v61  ;;  %v123_v60 = vpop.xlane.xlu0 %122 }
  0xc8   :  { %1289 = vmatmul.msk.f32.gmra.mxu1 %vm343_vm1, %v1767_v63 }
  0xc9   :  { %1395 = vrcp.f32 %v316_v0  ;;  %v265_v2 = vsub.f32 %v102_v62, %v249_v1  ;;  %v120_v0 = vpop.xlane.xlu2 %119  ;;  %v490_v1 = vld [vmem:[%s2265_s5 + $0x8] sm:$0xff] }
  0xca   :  { %553 = vmatpush.msra.mxu2 %v490_v1 }
  0xcb   :  { %v285_v3 = vadd.f32 %v1733_v58, %v265_v2 }
  0xcd   :  { %v301_v4 = vmax.f32 %v285_v3, 0.0 }
  0xce   :  { %v220_v6 = vpop.f32.mrf.mxu0 }
  0xcf   :  { %v1772_v10 = vpop.eup %1395  ;;  %v317_v11 = vadd.f32 1.0, %v301_v4  ;;  %v250_v12 = vmul.f32 2.0, %v220_v6  ;;  %v272_v6 = vsub.f32 %v123_v60, %v256_v59 }
  0xd0   :  { %1290 = vmatmul.msk.f32.gmra.mxu1 %vm343_vm1, %v1772_v10 }
  0xd1   :  { %1397 = vrcp.f32 %v317_v11  ;;  %v266_v14 = vsub.f32 %v105_v8, %v250_v12  ;;  %v292_v12 = vadd.f32 %v1733_v58, %v272_v6 }
  0xd3   :  { %v286_v15 = vadd.f32 %v1733_v58, %v266_v14 }
  0xd5   :  { %v302_v16 = vmax.f32 %v286_v15, 0.0  ;;  %v489_v15 = vld [vmem:[%s2265_s5] sm:$0xff] }
  0xd6   :  { %v223_v18 = vpop.f32.mrf.mxu0  ;;  %554 = vmatpush.msra.mxu2 %v489_v15 }
  0xd7   :  { %v1777_v22 = vpop.eup %1397  ;;  %v318_v24 = vadd.f32 1.0, %v302_v16  ;;  %v251_v25 = vmul.f32 2.0, %v223_v18 }
  0xd8   :  { %1291 = vmatmul.msk.f32.gmra.mxu1 %vm343_vm1, %v1777_v22 }
  0xd9   :  { %1399 = vrcp.f32 %v318_v24  ;;  %v267_v27 = vsub.f32 %v108_v21, %v251_v25  ;;  %v308_v21 = vmax.f32 %v292_v12, 0.0 }
  0xdb   :  { %v287_v28 = vadd.f32 %v1733_v58, %v267_v27  ;;  %v324_v24 = vadd.f32 1.0, %v308_v21 }
  0xdd   :  { %v303_v29 = vmax.f32 %v287_v28, 0.0 }
  0xde   :  { %v226_v31 = vpop.f32.mrf.mxu0 }
  0xdf   :  { %v1782_v33 = vpop.eup %1399  ;;  %v319_v34 = vadd.f32 1.0, %v303_v29  ;;  %v252_v35 = vmul.f32 2.0, %v226_v31 }
  0xe0   :  { %1292 = vmatmul.msk.f32.gmra.mxu1 %vm343_vm1, %v1782_v33 }
  0xe1   :  { %1401 = vrcp.f32 %v319_v34  ;;  %v268_v36 = vsub.f32 %v111_v32, %v252_v35 }
  0xe3   :  { %v288_v37 = vadd.f32 %v1733_v58, %v268_v36 }
  0xe5   :  { %v304_v39 = vmax.f32 %v288_v37, 0.0 }
  0xe6   :  { %v229_v40 = vpop.f32.mrf.mxu0 }
  0xe7   :  { %v1787_v42 = vpop.eup %1401  ;;  %v320_v43 = vadd.f32 1.0, %v304_v39  ;;  %v253_v44 = vmul.f32 2.0, %v229_v40 }
  0xe8   :  { %1293 = vmatmul.msk.f32.gmra.mxu1 %vm343_vm1, %v1787_v42 }
  0xe9   :  { %1403 = vrcp.f32 %v320_v43  ;;  %v269_v45 = vsub.f32 %v114_v41, %v253_v44 }
  0xeb   :  { %v289_v47 = vadd.f32 %v1733_v58, %v269_v45 }
  0xed   :  { %v305_v48 = vmax.f32 %v289_v47, 0.0 }
  0xee   :  { %v232_v49 = vpop.f32.mrf.mxu0 }
  0xef   :  { %v1792_v51 = vpop.eup %1403  ;;  %v321_v52 = vadd.f32 1.0, %v305_v48  ;;  %v254_v53 = vmul.f32 2.0, %v232_v49 }
  0xf0   :  { %1294 = vmatmul.msk.f32.gmra.mxu1 %vm343_vm1, %v1792_v51 }
  0xf1   :  { %1405 = vrcp.f32 %v321_v52  ;;  %v270_v56 = vsub.f32 %v117_v50, %v254_v53 }
  0xf3   :  { %v290_v57 = vadd.f32 %v1733_v58, %v270_v56 }
  0xf5   :  { %v306_v61 = vmax.f32 %v290_v57, 0.0 }
  0xf6   :  { %v235_v62 = vpop.f32.mrf.mxu0 }
  0xf7   :  { %v1800_v2 = vpop.eup %1405  ;;  %v322_v3 = vadd.f32 1.0, %v306_v61  ;;  %v255_v4 = vmul.f32 2.0, %v235_v62 }
  0xf8   :  { %1295 = vmatmul.msk.f32.gmra.mxu1 %vm343_vm1, %v1800_v2 }
  0xf9   :  { %1407 = vrcp.f32 %v322_v3  ;;  %v271_v8 = vsub.f32 %v120_v0, %v255_v4 }
  0xfb   :  { %v291_v11 = vadd.f32 %v1733_v58, %v271_v8 }
  0xfd   :  { %v307_v14 = vmax.f32 %v291_v11, 0.0 }
  0xff   :  { %v1809_v16 = vpop.eup %1407  ;;  %v323_v18 = vadd.f32 1.0, %v307_v14 }
 0x100   :  { %1296 = vmatmul.msk.f32.gmra.mxu1 %vm343_vm1, %v1809_v16 }
 0x101   :  { %1409 = vrcp.f32 %v323_v18 }
 0x102   :  { %1411 = vrcp.f32 %v324_v24 }
 0x107   :  { %v1813_v25 = vpop.eup %1409 }
 0x108   :  { %1297 = vmatmul.msk.f32.gmra.mxu1 %vm343_vm1, %v1813_v25  ;;  %v1817_v58 = vpop.eup %1411 }
 0x110   :  { %1298 = vmatmul.msk.f32.gmra.mxu1 %vm343_vm1, %v1817_v58 }
 0x115   :  { %v409_v27 = vpop.f32.mrf.mxu1 }
 0x116   :  { %1413 = vrcp.f32 %v409_v27 }
 0x11c   :  { %v1414_v28 = vpop.eup %1413 }
 0x11d   :  { %v412_v29 = vpop.f32.mrf.mxu1  ;;  %v473_v31 = vmul.f32 %v1414_v28, %v1737_v9 }
 0x11e   :  { %1415 = vrcp.f32 %v412_v29 }
 0x11f   :  { %1299 = vmatmul.msk.f32.vlgmr.msra.gmra.mxu2 %vm343_vm1, %v473_v31 }
 0x124   :  { %v1416_v32 = vpop.eup %1415 }
 0x125   :  { %v415_v34 = vpop.f32.mrf.mxu1  ;;  %v474_v35 = vmul.f32 %v1416_v32, %v1742_v19 }
 0x126   :  { %1417 = vrcp.f32 %v415_v34 }
 0x127   :  { %1300 = vmatmul.msk.f32.gmra.mxu2 %vm343_vm1, %v474_v35 }
 0x12c   :  { %v1418_v36 = vpop.eup %1417 }
 0x12d   :  { %v418_v37 = vpop.f32.mrf.mxu1  ;;  %v475_v39 = vmul.f32 %v1418_v36, %v1747_v30 }
 0x12e   :  { %1419 = vrcp.f32 %v418_v37 }
 0x12f   :  { %1301 = vmatmul.msk.f32.gmra.mxu2 %vm343_vm1, %v475_v39 }
 0x134   :  { %v1420_v40 = vpop.eup %1419 }
 0x135   :  { %v421_v41 = vpop.f32.mrf.mxu1  ;;  %v476_v9 = vmul.f32 %v1420_v40, %v1752_v38 }
 0x136   :  { %1421 = vrcp.f32 %v421_v41 }
 0x137   :  { %1302 = vmatmul.msk.f32.gmra.mxu2 %vm343_vm1, %v476_v9 }
 0x13c   :  { %v1422_v43 = vpop.eup %1421 }
 0x13d   :  { %v424_v44 = vpop.f32.mrf.mxu1  ;;  %v477_v19 = vmul.f32 %v1422_v43, %v1757_v46 }
 0x13e   :  { %1423 = vrcp.f32 %v424_v44 }
 0x13f   :  { %1303 = vmatmul.msk.f32.gmra.mxu2 %vm343_vm1, %v477_v19 }
 0x144   :  { %v1424_v45 = vpop.eup %1423 }
 0x145   :  { %v427_v47 = vpop.f32.mrf.mxu1  ;;  %v478_v30 = vmul.f32 %v1424_v45, %v1762_v54 }
 0x146   :  { %1425 = vrcp.f32 %v427_v47 }
 0x147   :  { %1304 = vmatmul.msk.f32.gmra.mxu2 %vm343_vm1, %v478_v30 }
 0x14c   :  { %v1426_v48 = vpop.eup %1425 }
 0x14d   :  { %v430_v49 = vpop.f32.mrf.mxu1  ;;  %v479_v38 = vmul.f32 %v1426_v48, %v1767_v63 }
 0x14e   :  { %1427 = vrcp.f32 %v430_v49 }
 0x14f   :  { %1305 = vmatmul.msk.f32.gmra.mxu2 %vm343_vm1, %v479_v38 }
 0x154   :  { %v1428_v50 = vpop.eup %1427 }
 0x155   :  { %v433_v52 = vpop.f32.mrf.mxu1  ;;  %v480_v46 = vmul.f32 %v1428_v50, %v1772_v10 }
 0x156   :  { %1429 = vrcp.f32 %v433_v52 }
 0x157   :  { %1306 = vmatmul.msk.f32.gmra.mxu2 %vm343_vm1, %v480_v46 }
 0x15c   :  { %v1430_v53 = vpop.eup %1429 }
 0x15d   :  { %v436_v55 = vpop.f32.mrf.mxu1  ;;  %v481_v54 = vmul.f32 %v1430_v53, %v1777_v22 }
 0x15e   :  { %1431 = vrcp.f32 %v436_v55 }
 0x15f   :  { %1307 = vmatmul.msk.f32.gmra.mxu2 %vm343_vm1, %v481_v54 }
 0x164   :  { %v1432_v56 = vpop.eup %1431 }
 0x165   :  { %v439_v57 = vpop.f32.mrf.mxu1  ;;  %v482_v63 = vmul.f32 %v1432_v56, %v1782_v33 }
 0x166   :  { %1433 = vrcp.f32 %v439_v57 }
 0x167   :  { %1308 = vmatmul.msk.f32.gmra.mxu2 %vm343_vm1, %v482_v63 }
 0x16c   :  { %v1434_v59 = vpop.eup %1433 }
 0x16d   :  { %v442_v60 = vpop.f32.mrf.mxu1  ;;  %v483_v10 = vmul.f32 %v1434_v59, %v1787_v42 }
 0x16e   :  { %1435 = vrcp.f32 %v442_v60 }
 0x16f   :  { %1309 = vmatmul.msk.f32.gmra.mxu2 %vm343_vm1, %v483_v10 }
 0x174   :  { %v1436_v61 = vpop.eup %1435 }
 0x175   :  { %v445_v62 = vpop.f32.mrf.mxu1  ;;  %v484_v22 = vmul.f32 %v1436_v61, %v1792_v51 }
 0x176   :  { %1437 = vrcp.f32 %v445_v62 }
 0x177   :  { %1310 = vmatmul.msk.f32.gmra.mxu2 %vm343_vm1, %v484_v22 }
 0x17c   :  { %v1438_v0 = vpop.eup %1437 }
 0x17d   :  { %v448_v1 = vpop.f32.mrf.mxu1  ;;  %v485_v33 = vmul.f32 %v1438_v0, %v1800_v2 }
 0x17e   :  { %1439 = vrcp.f32 %v448_v1 }
 0x17f   :  { %1311 = vmatmul.msk.f32.gmra.mxu2 %vm343_vm1, %v485_v33 }
 0x184   :  { %v1440_v3 = vpop.eup %1439 }
 0x185   :  { %v451_v4 = vpop.f32.mrf.mxu1  ;;  %v486_v42 = vmul.f32 %v1440_v3, %v1809_v16 }
 0x186   :  { %1441 = vrcp.f32 %v451_v4 }
 0x187   :  { %1312 = vmatmul.msk.f32.gmra.mxu2 %vm343_vm1, %v486_v42 }
 0x18c   :  { %v1442_v6 = vpop.eup %1441 }
 0x18d   :  { %v454_v8 = vpop.f32.mrf.mxu1  ;;  %v487_v51 = vmul.f32 %v1442_v6, %v1813_v25 }
 0x18e   :  { %1443 = vrcp.f32 %v454_v8 }
 0x18f   :  { %1313 = vmatmul.msk.f32.gmra.mxu2 %vm343_vm1, %v487_v51 }
 0x194   :  { %v1444_v11 = vpop.eup %1443 }
 0x195   :  { %v488_v2 = vmul.f32 %v1444_v11, %v1817_v58 }
 0x197   :  { %1314 = vmatmul.msk.f32.gmra.mxu2 %vm343_vm1, %v488_v2 }
 0x1a2   :  { %v556_v12 = vpop.f32.mrf.mxu2 }
 0x1a3   :  { %v605_v14 = vsel %vm604_vm2, %v556_v12, -inf }
 0x1a4   :  { %606 = vmax.xlane.f32.xlu1 %v605_v14 }
 0x1aa   :  { %v559_v15 = vpop.f32.mrf.mxu2 }
 0x1ab   :  { %v608_v16 = vsel %vm604_vm2, %v559_v15, -inf }
 0x1ac   :  { %609 = vmax.xlane.f32.xlu2 %v608_v16 }
 0x1b2   :  { %v562_v18 = vpop.f32.mrf.mxu2 }
 0x1b3   :  { %v611_v21 = vsel %vm604_vm2, %v562_v18, -inf }
 0x1b4   :  { %612 = vmax.xlane.f32.xlu0 %v611_v21 }
 0x1ba   :  { %v565_v24 = vpop.f32.mrf.mxu2 }
 0x1bb   :  { %v614_v25 = vsel %vm604_vm2, %v565_v24, -inf }
 0x1bc   :  { %615 = vmax.xlane.f32.xlu1 %v614_v25 }
 0x1c2   :  { %v568_v58 = vpop.f32.mrf.mxu2 }
 0x1c3   :  { %v617_v27 = vsel %vm604_vm2, %v568_v58, -inf }
 0x1c4   :  { %618 = vmax.xlane.f32.xlu2 %v617_v27 }
 0x1ca   :  { %v571_v28 = vpop.f32.mrf.mxu2 }
 0x1cb   :  { %v620_v29 = vsel %vm604_vm2, %v571_v28, -inf }
 0x1cc   :  { %621 = vmax.xlane.f32.xlu0 %v620_v29 }
 0x1d2   :  { %v1859_v31 = vpop.f32.mrf.mxu2 }
 0x1d3   :  { %v623_v32 = vsel %vm604_vm2, %v1859_v31, -inf }
 0x1d4   :  { %624 = vmax.xlane.f32.xlu1 %v623_v32 }
 0x1da   :  { %v1863_v34 = vpop.f32.mrf.mxu2 }
 0x1db   :  { %v626_v35 = vsel %vm604_vm2, %v1863_v34, -inf }
 0x1dc   :  { %627 = vmax.xlane.f32.xlu2 %v626_v35 }
 0x1e2   :  { %v1867_v36 = vpop.f32.mrf.mxu2 }
 0x1e3   :  { %v629_v37 = vsel %vm604_vm2, %v1867_v36, -inf }
 0x1e4   :  { %630 = vmax.xlane.f32.xlu2 %v629_v37 }
 0x1ea   :  { %v1871_v9 = vpop.f32.mrf.mxu2 }
 0x1eb   :  { %v632_v46 = vsel %vm604_vm2, %v1871_v9, -inf }
 0x1f2   :  { %v1877_v30 = vpop.f32.mrf.mxu2 }
 0x1f3   :  { %v635_v63 = vsel %vm604_vm2, %v1877_v30, -inf }
 0x1fa   :  { %v1885_v55 = vpop.f32.mrf.mxu2 }
 0x1fb   :  { %v638_v1 = vsel %vm604_vm2, %v1885_v55, -inf }
 0x202   :  { %v1895_v62 = vpop.f32.mrf.mxu2 }
 0x203   :  { %v641_v8 = vsel %vm604_vm2, %v1895_v62, -inf }
 0x20a   :  { %v1907_v51 = vpop.f32.mrf.mxu2 }
 0x217   :  { %v607_v39 = vpop.xlane.xlu1 %606 }
 0x218   :  { %v653_v40 = vsub.f32 %v556_v12, %v607_v39 }
 0x21a   :  { %v669_v41 = vmul.f32 1.442695, %v653_v40 }
 0x21c   :  { %1445 = vpow2.f32 %v669_v41 }
 0x21f   :  { %v610_v43 = vpop.xlane.xlu2 %609 }
 0x220   :  { %v654_v44 = vsub.f32 %v559_v15, %v610_v43  ;;  %v644_v15 = vsel %vm604_vm2, %v1907_v51, -inf  ;;  %v1371_v43 = vld [vmem:[%s2266_s6 + $0x14] sm:$0xf0] }
 0x222   :  { %v1873_v19 = vpop.eup %1445  ;;  %v671_v45 = vmul.f32 1.442695, %v654_v44  ;;  %v1370_v44 = vld [vmem:[%s2266_s6 + $0x14] sm:$0xf] }
 0x223   :  { %v701_v47 = vsel %vm604_vm2, %v1873_v19, 0.0 }
 0x224   :  { %1447 = vpow2.f32 %v671_v45  ;;  %702 = vadd.xlane.f32.xlu0 %v701_v47  ;;  %v1327_v47 = vld [vmem:[%s2266_s6 + $0x18] sm:$0xf0] }
 0x227   :  { %v613_v48 = vpop.xlane.xlu0 %612 }
 0x228   :  { %v655_v49 = vsub.f32 %v562_v18, %v613_v48  ;;  %v1916_v18 = vpop.f32.mrf.mxu2  ;;  %v943_v48 = vld [vmem:[%s2267_s7] sm:$0xff] }
 0x229   :  { %v647_v27 = vsel %vm604_vm2, %v1916_v18, -inf }
 0x22a   :  { %v1879_v38 = vpop.eup %1447  ;;  %v673_v50 = vmul.f32 1.442695, %v655_v49  ;;  %v1330_v49 = vor.u32 %v1370_v44, %v1327_v47 }
 0x22b   :  { %v704_v52 = vsel %vm604_vm2, %v1879_v38, 0.0 }
 0x22c   :  { %1449 = vpow2.f32 %v673_v50  ;;  %705 = vadd.xlane.f32.xlu1 %v704_v52  ;;  %633 = vmax.xlane.f32.xlu0 %v632_v46  ;;  %v945_v50 = vunpack.c.l.b16 %v943_v48  ;;  %v946_v52 = vunpack.c.h.b16 %v943_v48  ;;  %v1317_v46 = vld [vmem:[%s2266_s6] sm:$0xf] }
 0x22d   :  { %892 = vmatpush.bf16.msrb.mxu1 %v1330_v49 }
 0x22f   :  { %v616_v53 = vpop.xlane.xlu1 %615 }
 0x230   :  { %v656_v54 = vsub.f32 %v565_v24, %v616_v53  ;;  %v1369_v53 = vld [vmem:[%s2266_s6 + $0x4] sm:$0xf0] }
 0x232   :  { %v1887_v56 = vpop.eup %1449  ;;  %v675_v57 = vmul.f32 1.442695, %v656_v54  ;;  %v1368_v54 = vld [vmem:[%s2266_s6 + $0x4] sm:$0xf] }
 0x233   :  { %v707_v59 = vsel %vm604_vm2, %v1887_v56, 0.0 }
 0x234   :  { %1451 = vpow2.f32 %v675_v57  ;;  %636 = vmax.xlane.f32.xlu0 %v635_v63  ;;  %708 = vadd.xlane.f32.xlu1 %v707_v59  ;;  %v947_v57 = vpack.c.b16 %v945_v50, %v945_v50  ;;  %v948_v63 = vpack.c.b16 %v946_v52, %v946_v52  ;;  %v1318_v59 = vor.u32 %v1369_v53, %v1317_v46 }
 0x237   :  { %v619_v60 = vpop.xlane.xlu2 %618 }
 0x238   :  { %v657_v10 = vsub.f32 %v568_v58, %v619_v60  ;;  %v1319_v60 = vld [vmem:[%s2266_s6 + $0x8] sm:$0xf0] }
 0x23a   :  { %v1893_v61 = vpop.eup %1451  ;;  %v677_v22 = vmul.f32 1.442695, %v657_v10  ;;  %v1322_v10 = vor.u32 %v1368_v54, %v1319_v60 }
 0x23b   :  { %v710_v0 = vsel %vm604_vm2, %v1893_v61, 0.0 }
 0x23c   :  { %1453 = vpow2.f32 %v677_v22  ;;  %711 = vadd.xlane.f32.xlu2 %v710_v0  ;;  %639 = vmax.xlane.f32.xlu1 %v638_v1  ;;  %v975_v22 = vsel %vm973_vm3, %v947_v57, 0  ;;  %v978_v0 = vsel %vm973_vm3, %v948_v63, 0 }
 0x23d   :  { %987 = vmatpush.bf16.msrb.mxu2 %v975_v22  ;;  %893 = vmatpush.bf16.msrb.mxu1 %v1322_v10 }
 0x23e   :  { %1036 = vmatpush.bf16.msrb.mxu0 %v978_v0 }
 0x23f   :  { %v622_v33 = vpop.xlane.xlu0 %621 }
 0x240   :  { %v658_v3 = vsub.f32 %v571_v28, %v622_v33  ;;  %1339 = vmatmul.msk.bf16.vlgmr.msrb.gmra.mxu1 %vm75_vm0, %v1615_v5  ;;  %v782_v33 = vpack.c.bf16 %v1632_v13, %v1620_v7 }
 0x242   :  { %v1901_v4 = vpop.eup %1453  ;;  %v679_v42 = vmul.f32 1.442695, %v658_v3 }
 0x243   :  { %v713_v6 = vsel %vm604_vm2, %v1901_v4, 0.0 }
 0x244   :  { %1455 = vpow2.f32 %v679_v42  ;;  %714 = vadd.xlane.f32.xlu2 %v713_v6  ;;  %642 = vmax.xlane.f32.xlu1 %v641_v8 }
 0x247   :  { %v625_v11 = vpop.xlane.xlu1 %624 }
 0x248   :  { %v659_v2 = vsub.f32 %v1859_v31, %v625_v11  ;;  %v1925_v31 = vpop.f32.mrf.mxu2 }
 0x249   :  { %v650_v39 = vsel %vm604_vm2, %v1925_v31, -inf }
 0x24a   :  { %v1910_v12 = vpop.eup %1455  ;;  %v681_v14 = vmul.f32 1.442695, %v659_v2 }
 0x24b   :  { %v716_v16 = vsel %vm604_vm2, %v1910_v12, 0.0 }
 0x24c   :  { %1457 = vpow2.f32 %v681_v14  ;;  %645 = vmax.xlane.f32.xlu2 %v644_v15  ;;  %717 = vadd.xlane.f32.xlu0 %v716_v16 }
 0x24f   :  { %v628_v21 = vpop.xlane.xlu2 %627 }
 0x250   :  { %v660_v24 = vsub.f32 %v1863_v34, %v628_v21  ;;  %1340 = vmatmul.msk.bf16.gmra.mxu1 %vm75_vm0, %v782_v33  ;;  %v783_v21 = vpack.c.bf16 %v1651_v20, %v1642_v17 }
 0x252   :  { %v1919_v25 = vpop.eup %1457  ;;  %v683_v58 = vmul.f32 1.442695, %v660_v24 }
 0x253   :  { %v719_v28 = vsel %vm604_vm2, %v1919_v25, 0.0 }
 0x254   :  { %1459 = vpow2.f32 %v683_v58  ;;  %648 = vmax.xlane.f32.xlu2 %v647_v27  ;;  %720 = vadd.xlane.f32.xlu0 %v719_v28 }
 0x257   :  { %v631_v29 = vpop.xlane.xlu2 %630 }
 0x258   :  { %v661_v32 = vsub.f32 %v1867_v36, %v631_v29  ;;  %v1325_v36 = vld [vmem:[%s2266_s6 + $0x10] sm:$0xf]  ;;  %s1544_s6 = smov [#allocation3]  }
 0x259   :  { %v1326_v45 = vor.u32 %v1371_v43, %v1325_v36  ;;  %s1256_s14 = sshll.u32 %s1544_s6, 4  ;;  %s1257_s14 = int_to_ptr.vmem [resolvable:$true] %s1256_s14 }
 0x25a   :  { %v1928_v35 = vpop.eup %1459  ;;  %v685_v34 = vmul.f32 1.442695, %v661_v32 }
 0x25b   :  { %v722_v37 = vsel %vm604_vm2, %v1928_v35, 0.0  ;;  %843 = vmatpush.bf16.msrb.mxu3 %v1326_v45 }
 0x25c   :  { %1461 = vpow2.f32 %v685_v34  ;;  %723 = vadd.xlane.f32.xlu1 %v722_v37  ;;  %651 = vmax.xlane.f32.xlu0 %v650_v39 }
 0x25f   :  { %844 = vmatpush.bf16.msrb.mxu3 %v1318_v59 }
 0x260   :  { %1341 = vmatmul.msk.bf16.gmra.mxu1 %vm75_vm0, %v783_v21 }
 0x262   :  { %v1934_v40 = vpop.eup %1461  ;;  %1331 = vmatmul.msk.bf16.vlgmr.msrb.gmra.mxu3 %vm75_vm0, %v1615_v5 }
 0x263   :  { %v725_v41 = vsel %vm604_vm2, %v1934_v40, 0.0 }
 0x264   :  { %726 = vadd.xlane.f32.xlu1 %v725_v41 }
 0x272   :  { %1332 = vmatmul.msk.bf16.gmra.mxu3 %vm75_vm0, %v782_v33 }
 0x282   :  { %1333 = vmatmul.msk.bf16.gmra.mxu3 %vm75_vm0, %v783_v21  ;;  %v1514_v21 = vld [vmem:[%s2260_s0 + $0x68] sm:$0xff] }
 0x297   :  { %v703_v1 = vpop.xlane.xlu0 %702 }
 0x298   :  { %1463 = vrcp.f32 %v703_v1 }
 0x29e   :  { %v1464_v11 = vpop.eup %1463 }
 0x29f   :  { %v706_v3 = vpop.xlane.xlu1 %705  ;;  %v634_v42 = vpop.xlane.xlu0 %633  ;;  %v765_v5 = vmul.f32 %v1464_v11, %v1873_v19  ;;  %v1511_v11 = vld [vmem:[%s2260_s0 + $0x50] sm:$0xff] }
 0x2a0   :  { %1465 = vrcp.f32 %v706_v3  ;;  %v662_v6 = vsub.f32 %v1871_v9, %v634_v42 }
 0x2a2   :  { %v687_v8 = vmul.f32 1.442695, %v662_v6 }
 0x2a4   :  { %1467 = vpow2.f32 %v687_v8  ;;  %v1509_v8 = vld [vmem:[%s2260_s0 + $0x40] sm:$0xff] }
 0x2a6   :  { %v1466_v2 = vpop.eup %1465 }
 0x2a7   :  { %v766_v14 = vmul.f32 %v1466_v2, %v1879_v38  ;;  %v709_v15 = vpop.xlane.xlu1 %708  ;;  %v637_v7 = vpop.xlane.xlu0 %636  ;;  %v1512_v2 = vld [vmem:[%s2260_s0 + $0x58] sm:$0xff] }
 0x2a8   :  { %v663_v13 = vsub.f32 %v1877_v30, %v637_v7 }
 0x2a9   :  { %v935_v16 = vpack.c.bf16 %v766_v14, %v765_v5  ;;  %v786_v5 = vpack.c.bf16 %v1512_v2, %v1511_v11 }
 0x2aa   :  { %v1979_v24 = vpop.eup %1467  ;;  %v689_v58 = vmul.f32 1.442695, %v663_v13 }
 0x2ab   :  { %1347 = vmatmul.msk.bf16.vlgmr.msrb.gmra.mxu2 %vm604_vm2, %v935_v16  ;;  %1355 = vmatmul.msk.bf16.vlgmr.msrb.gmra.mxu0 %vm604_vm2, %v935_v16  ;;  %v728_v9 = vsel %vm604_vm2, %v1979_v24, 0.0  ;;  %v1513_v16 = vld [vmem:[%s2260_s0 + $0x60] sm:$0xff] }
 0x2ac   :  { %1469 = vpow2.f32 %v689_v58  ;;  %729 = vadd.xlane.f32.xlu2 %v728_v9  ;;  %v787_v58 = vpack.c.bf16 %v1514_v21, %v1513_v16 }
 0x2ad   :  { %1471 = vrcp.f32 %v709_v15 }
 0x2af   :  { %v712_v19 = vpop.xlane.xlu2 %711  ;;  %v640_v30 = vpop.xlane.xlu1 %639 }
 0x2b0   :  { %1473 = vrcp.f32 %v712_v19  ;;  %v664_v17 = vsub.f32 %v1885_v55, %v640_v30  ;;  %v784_v55 = vpack.c.bf16 %v1671_v26, %v1661_v23 }
 0x2b2   :  { %v1988_v20 = vpop.eup %1469  ;;  %v691_v38 = vmul.f32 1.442695, %v664_v17  ;;  %1334 = vmatmul.msk.bf16.gmra.mxu3 %vm75_vm0, %v784_v55  ;;  %1342 = vmatmul.msk.bf16.gmra.mxu1 %vm75_vm0, %v784_v55 }
 0x2b3   :  { %v731_v27 = vsel %vm604_vm2, %v1988_v20, 0.0  ;;  %v1472_v28 = vpop.eup %1471 }
 0x2b4   :  { %1475 = vpow2.f32 %v691_v38  ;;  %732 = vadd.xlane.f32.xlu0 %v731_v27  ;;  %v767_v37 = vmul.f32 %v1472_v28, %v1887_v56 }
 0x2b6   :  { %v1474_v29 = vpop.eup %1473 }
 0x2b7   :  { %v715_v32 = vpop.xlane.xlu2 %714  ;;  %v643_v34 = vpop.xlane.xlu1 %642  ;;  %v768_v39 = vmul.f32 %v1474_v29, %v1893_v61 }
 0x2b8   :  { %v665_v41 = vsub.f32 %v1895_v62, %v643_v34 }
 0x2b9   :  { %v936_v36 = vpack.c.bf16 %v768_v39, %v767_v37 }
 0x2ba   :  { %v1997_v43 = vpop.eup %1475  ;;  %v693_v44 = vmul.f32 1.442695, %v665_v41 }
 0x2bb   :  { %1348 = vmatmul.msk.bf16.gmra.mxu2 %vm604_vm2, %v936_v36  ;;  %1356 = vmatmul.msk.bf16.gmra.mxu0 %vm604_vm2, %v936_v36  ;;  %v734_v45 = vsel %vm604_vm2, %v1997_v43, 0.0 }
 0x2bc   :  { %1477 = vpow2.f32 %v693_v44  ;;  %735 = vadd.xlane.f32.xlu1 %v734_v45  ;;  %v1516_v44 = vld [vmem:[%s2260_s0 + $0x78] sm:$0xff] }
 0x2bd   :  { %1479 = vrcp.f32 %v715_v32  ;;  %v895_v14 = vpop.f32.mrf.mxu1 }
 0x2bf   :  { %v646_v56 = vpop.xlane.xlu2 %645  ;;  %v718_v61 = vpop.xlane.xlu0 %717 }
 0x2c0   :  { %v666_v23 = vsub.f32 %v1907_v51, %v646_v56  ;;  %1481 = vrcp.f32 %v718_v61 }
 0x2c2   :  { %v2006_v26 = vpop.eup %1477  ;;  %v695_v62 = vmul.f32 1.442695, %v666_v23 }
 0x2c3   :  { %v737_v47 = vsel %vm604_vm2, %v2006_v26, 0.0  ;;  %v1480_v48 = vpop.eup %1479 }
 0x2c4   :  { %1483 = vpow2.f32 %v695_v62  ;;  %738 = vadd.xlane.f32.xlu2 %v737_v47  ;;  %v769_v46 = vmul.f32 %v1480_v48, %v1901_v4 }
 0x2c5   :  { %v897_v9 = vpop.f32.mrf.mxu1 }
 0x2c6   :  { %v1482_v49 = vpop.eup %1481 }
 0x2c7   :  { %v649_v50 = vpop.xlane.xlu2 %648  ;;  %v721_v52 = vpop.xlane.xlu0 %720  ;;  %v770_v53 = vmul.f32 %v1482_v49, %v1910_v12 }
 0x2c8   :  { %v667_v54 = vsub.f32 %v1916_v18, %v649_v50 }
 0x2c9   :  { %v937_v51 = vpack.c.bf16 %v770_v53, %v769_v46 }
 0x2ca   :  { %v2013_v57 = vpop.eup %1483  ;;  %v697_v63 = vmul.f32 1.442695, %v667_v54 }
 0x2cb   :  { %1349 = vmatmul.msk.bf16.gmra.mxu2 %vm604_vm2, %v937_v51  ;;  %1357 = vmatmul.msk.bf16.gmra.mxu0 %vm604_vm2, %v937_v51  ;;  %v740_v59 = vsel %vm604_vm2, %v2013_v57, 0.0 }
 0x2cc   :  { %1485 = vpow2.f32 %v697_v63  ;;  %741 = vadd.xlane.f32.xlu0 %v740_v59 }
 0x2cd   :  { %1487 = vrcp.f32 %v721_v52  ;;  %v900_v37 = vpop.f32.mrf.mxu1 }
 0x2cf   :  { %v724_v60 = vpop.xlane.xlu1 %723  ;;  %v652_v4 = vpop.xlane.xlu0 %651 }
 0x2d0   :  { %1489 = vrcp.f32 %v724_v60  ;;  %v668_v12 = vsub.f32 %v1925_v31, %v652_v4 }
 0x2d2   :  { %v2020_v18 = vpop.eup %1485  ;;  %v699_v10 = vmul.f32 1.442695, %v668_v12 }
 0x2d3   :  { %v743_v22 = vsel %vm604_vm2, %v2020_v18, 0.0  ;;  %v1488_v0 = vpop.eup %1487 }
 0x2d4   :  { %1491 = vpow2.f32 %v699_v10  ;;  %744 = vadd.xlane.f32.xlu1 %v743_v22  ;;  %v771_v33 = vmul.f32 %v1488_v0, %v1919_v25  ;;  %v1510_v25 = vld [vmem:[%s2260_s0 + $0x48] sm:$0xff] }
 0x2d5   :  { %v902_v48 = vpop.f32.mrf.mxu1 }
 0x2d6   :  { %v1490_v1 = vpop.eup %1489 }
 0x2d7   :  { %v772_v3 = vmul.f32 %v1490_v1, %v1928_v35  ;;  %v785_v35 = vpack.c.bf16 %v1510_v25, %v1509_v8  ;;  %v727_v15 = vpop.xlane.xlu1 %726 }
 0x2d8   :  { %1493 = vrcp.f32 %v727_v15 }
 0x2d9   :  { %v938_v42 = vpack.c.bf16 %v772_v3, %v771_v33  ;;  %1335 = vmatmul.msk.bf16.gmra.mxu3 %vm75_vm0, %v785_v35  ;;  %1343 = vmatmul.msk.bf16.gmra.mxu1 %vm75_vm0, %v785_v35 }
 0x2da   :  { %v2026_v6 = vpop.eup %1491 }
 0x2db   :  { %1350 = vmatmul.msk.bf16.gmra.mxu2 %vm604_vm2, %v938_v42  ;;  %1358 = vmatmul.msk.bf16.gmra.mxu0 %vm604_vm2, %v938_v42  ;;  %v746_v31 = vsel %vm604_vm2, %v2026_v6, 0.0 }
 0x2dc   :  { %747 = vadd.xlane.f32.xlu2 %v746_v31 }
 0x2dd   :  { %v905_v12 = vpop.f32.mrf.mxu1 }
 0x2de   :  { %v1494_v19 = vpop.eup %1493 }
 0x2df   :  { %v773_v17 = vmul.f32 %v1494_v19, %v1934_v40 }
 0x2e5   :  { %v846_v7 = vpop.f32.mrf.mxu3 }
 0x2e9   :  { %1336 = vmatmul.msk.bf16.gmra.mxu3 %vm75_vm0, %v786_v5  ;;  %1344 = vmatmul.msk.bf16.gmra.mxu1 %vm75_vm0, %v786_v5  ;;  %v907_v5 = vpop.f32.mrf.mxu1 }
 0x2ed   :  { %v848_v28 = vpop.f32.mrf.mxu3 }
 0x2f5   :  { %v851_v56 = vpop.f32.mrf.mxu3 }
 0x2f9   :  { %1337 = vmatmul.msk.bf16.gmra.mxu3 %vm75_vm0, %v787_v58  ;;  %1345 = vmatmul.msk.bf16.gmra.mxu1 %vm75_vm0, %v787_v58 }
 0x2fd   :  { %v853_v59 = vpop.f32.mrf.mxu3 }
 0x305   :  { %v856_v3 = vpop.f32.mrf.mxu3 }
 0x31f   :  { %v730_v13 = vpop.xlane.xlu2 %729 }
 0x320   :  { %1495 = vrcp.f32 %v730_v13  ;;  %v858_v13 = vpop.f32.mrf.mxu3 }
 0x326   :  { %v1496_v30 = vpop.eup %1495 }
 0x327   :  { %v774_v38 = vmul.f32 %v1496_v30, %v1979_v24  ;;  %v733_v34 = vpop.xlane.xlu0 %732  ;;  %v1515_v24 = vld [vmem:[%s2260_s0 + $0x70] sm:$0xff] }
 0x328   :  { %v1038_v27 = vpop.f32.mrf.mxu0  ;;  %1497 = vrcp.f32 %v733_v34  ;;  %v788_v45 = vpack.c.bf16 %v1516_v44, %v1515_v24 }
 0x329   :  { %v2058_v29 = vmul.f32 %v1038_v27, %v895_v14  ;;  %v939_v32 = vpack.c.bf16 %v774_v38, %v773_v17 }
 0x32a   :  { %1338 = vmatmul.msk.bf16.gmra.mxu3 %vm75_vm0, %v788_v45  ;;  %1346 = vmatmul.msk.bf16.gmra.mxu1 %vm75_vm0, %v788_v45 }
 0x32b   :  { %1351 = vmatmul.msk.bf16.gmra.mxu2 %vm604_vm2, %v939_v32  ;;  %1359 = vmatmul.msk.bf16.gmra.mxu0 %vm604_vm2, %v939_v32 }
 0x32e   :  { %v989_v39 = vpop.f32.mrf.mxu2  ;;  %v1498_v23 = vpop.eup %1497 }
 0x32f   :  { %v2062_v41 = vmul.f32 %v989_v39, %v846_v7  ;;  %v736_v36 = vpop.xlane.xlu1 %735  ;;  %v775_v49 = vmul.f32 %v1498_v23, %v1988_v20 }
 0x330   :  { %1499 = vrcp.f32 %v736_v36  ;;  %v1040_v40 = vpop.f32.mrf.mxu0 }
 0x331   :  { %v2064_v55 = vmul.f32 %v1040_v40, %v897_v9  ;;  %v910_v9 = vpop.f32.mrf.mxu1 }
 0x333   :  { %v1111_v61 = vpack.c.bf16 %v2064_v55, %v2058_v29  ;;  %v1182_v29 = vld [vmem:[%s2268_s8 + $0x58] sm:$0xff]  ;;  %v1181_v55 = vld [vmem:[%s2268_s8 + $0x50] sm:$0xff] }
 0x335   :  { %v861_v39 = vpop.f32.mrf.mxu3 }
 0x336   :  { %v1500_v62 = vpop.eup %1499  ;;  %v991_v47 = vpop.f32.mrf.mxu2 }
 0x337   :  { %v776_v50 = vmul.f32 %v1500_v62, %v1997_v43  ;;  %v2078_v52 = vmul.f32 %v991_v47, %v848_v28  ;;  %v739_v63 = vpop.xlane.xlu2 %738 }
 0x338   :  { %v1043_v46 = vpop.f32.mrf.mxu0  ;;  %1501 = vrcp.f32 %v739_v63 }
 0x339   :  { %v1110_v53 = vpack.c.bf16 %v2078_v52, %v2062_v41  ;;  %v2082_v54 = vmul.f32 %v1043_v46, %v900_v37  ;;  %v940_v51 = vpack.c.bf16 %v776_v50, %v775_v49  ;;  %v912_v40 = vpop.f32.mrf.mxu1  ;;  %v1186_v52 = vld [vmem:[%s2268_s8 + $0x78] sm:$0xff] }
 0x33b   :  { %1352 = vmatmul.msk.bf16.gmra.mxu2 %vm604_vm2, %v940_v51  ;;  %1360 = vmatmul.msk.bf16.gmra.mxu0 %vm604_vm2, %v940_v51 }
 0x33d   :  { %v863_v45 = vpop.f32.mrf.mxu3 }
 0x33e   :  { %v994_v60 = vpop.f32.mrf.mxu2  ;;  %v1502_v0 = vpop.eup %1501 }
 0x33f   :  { %v2086_v20 = vmul.f32 %v994_v60, %v851_v56  ;;  %v742_v43 = vpop.xlane.xlu0 %741  ;;  %v777_v42 = vmul.f32 %v1502_v0, %v2006_v26 }
 0x340   :  { %1503 = vrcp.f32 %v742_v43  ;;  %v1045_v4 = vpop.f32.mrf.mxu0 }
 0x341   :  { %v2088_v10 = vmul.f32 %v1045_v4, %v902_v48 }
 0x343   :  { %v1113_v22 = vpack.c.bf16 %v2088_v10, %v2082_v54  ;;  %v1184_v54 = vld [vmem:[%s2268_s8 + $0x68] sm:$0xff]  ;;  %v1183_v10 = vld [vmem:[%s2268_s8 + $0x60] sm:$0xff] }
 0x346   :  { %v1504_v1 = vpop.eup %1503  ;;  %v996_v33 = vpop.f32.mrf.mxu2 }
 0x347   :  { %v778_v31 = vmul.f32 %v1504_v1, %v2013_v57  ;;  %v2094_v8 = vmul.f32 %v996_v33, %v853_v59  ;;  %v745_v14 = vpop.xlane.xlu1 %744 }
 0x348   :  { %v1048_v25 = vpop.f32.mrf.mxu0  ;;  %1505 = vrcp.f32 %v745_v14 }
 0x349   :  { %v1112_v35 = vpack.c.bf16 %v2094_v8, %v2086_v20  ;;  %v2098_v11 = vmul.f32 %v1048_v25, %v905_v12  ;;  %v941_v2 = vpack.c.bf16 %v778_v31, %v777_v42 }
 0x34b   :  { %1353 = vmatmul.msk.bf16.gmra.mxu2 %vm604_vm2, %v941_v2  ;;  %1361 = vmatmul.msk.bf16.gmra.mxu0 %vm604_vm2, %v941_v2 }
 0x34e   :  { %v999_v15 = vpop.f32.mrf.mxu2  ;;  %v1506_v58 = vpop.eup %1505 }
 0x34f   :  { %v2102_v26 = vmul.f32 %v999_v15, %v856_v3  ;;  %v748_v57 = vpop.xlane.xlu2 %747  ;;  %v779_v17 = vmul.f32 %v1506_v58, %v2020_v18 }
 0x350   :  { %1507 = vrcp.f32 %v748_v57  ;;  %v1050_v7 = vpop.f32.mrf.mxu0 }
 0x351   :  { %v2104_v16 = vmul.f32 %v1050_v7, %v907_v5 }
 0x353   :  { %v1115_v21 = vpack.c.bf16 %v2104_v16, %v2098_v11  ;;  %v1178_v11 = vld [vmem:[%s2268_s8 + $0x38] sm:$0xff]  ;;  %v1177_v16 = vld [vmem:[%s2268_s8 + $0x30] sm:$0xff] }
 0x356   :  { %v1508_v19 = vpop.eup %1507  ;;  %v1001_v30 = vpop.f32.mrf.mxu2 }
 0x357   :  { %v780_v38 = vmul.f32 %v1508_v19, %v2026_v6  ;;  %v2110_v27 = vmul.f32 %v1001_v30, %v858_v13  ;;  %v915_v48 = vpop.f32.mrf.mxu1 }
 0x358   :  { %v1053_v28 = vpop.f32.mrf.mxu0 }
 0x359   :  { %v1114_v32 = vpack.c.bf16 %v2110_v27, %v2102_v26  ;;  %v2114_v34 = vmul.f32 %v1053_v28, %v910_v9  ;;  %v942_v37 = vpack.c.bf16 %v780_v38, %v779_v17 }
 0x35b   :  { %1354 = vmatmul.msk.bf16.gmra.mxu2 %vm604_vm2, %v942_v37  ;;  %1362 = vmatmul.msk.bf16.gmra.mxu0 %vm604_vm2, %v942_v37 }
 0x35c   :  { %v866_v47 = vpop.f32.mrf.mxu3 }
 0x35e   :  { %v1004_v36 = vpop.f32.mrf.mxu2 }
 0x35f   :  { %v1090_v24 = vmul.f32 %v1004_v36, %v861_v39  ;;  %v917_v12 = vpop.f32.mrf.mxu1 }
 0x360   :  { %v1055_v18 = vpop.f32.mrf.mxu0 }
 0x361   :  { %v2118_v44 = vmul.f32 %v1055_v18, %v912_v40 }
 0x363   :  { %v1117_v6 = vpack.c.bf16 %v2118_v44, %v2114_v34  ;;  %v1175_v34 = vld [vmem:[%s2268_s8 + $0x20] sm:$0xff]  ;;  %v1174_v44 = vld [vmem:[%s2268_s8 + $0x18] sm:$0xff] }
 0x364   :  { %v868_v46 = vpop.f32.mrf.mxu3 }
 0x366   :  { %v1006_v56 = vpop.f32.mrf.mxu2 }
 0x367   :  { %v1092_v23 = vmul.f32 %v1006_v56, %v863_v45  ;;  %v920_v3 = vpop.f32.mrf.mxu1 }
 0x369   :  { %v1116_v62 = vpack.c.bf16 %v1092_v23, %v1090_v24 }
 0x36c   :  { %v871_v59 = vpop.f32.mrf.mxu3 }
 0x36f   :  { %v922_v5 = vpop.f32.mrf.mxu1 }
 0x374   :  { %v873_v43 = vpop.f32.mrf.mxu3 }
 0x377   :  { %v925_v7 = vpop.f32.mrf.mxu1 }
 0x37c   :  { %v876_v33 = vpop.f32.mrf.mxu3 }
 0x37f   :  { %v927_v37 = vpop.f32.mrf.mxu1 }
 0x384   :  { %v878_v25 = vpop.f32.mrf.mxu3 }
 0x3a7   :  { %v930_v23 = vpop.f32.mrf.mxu1 }
 0x3a8   :  { %v1058_v49 = vpop.f32.mrf.mxu0 }
 0x3a9   :  { %v2122_v50 = vmul.f32 %v1058_v49, %v915_v48  ;;  %v1127_v48 = vlaneseq }
 0x3ad   :  { %v881_v15 = vpop.f32.mrf.mxu3 }
 0x3ae   :  { %v1009_v51 = vpop.f32.mrf.mxu2 }
 0x3af   :  { %v1094_v63 = vmul.f32 %v1009_v51, %v866_v47  ;;  %v932_v49 = vpop.f32.mrf.mxu1 }
 0x3b0   :  { %v1060_v0 = vpop.f32.mrf.mxu0 }
 0x3b1   :  { %v1097_v8 = vmul.f32 %v1060_v0, %v917_v12  ;;  %v1171_v12 = vld [vmem:[%s2268_s8] sm:$0xff]  ;;  %v1202_v0 = vld [vmem:[%s2268_s8 + $0xf8] sm:$0xff] }
 0x3b3   :  { %v1119_v41 = vpack.c.bf16 %v1097_v8, %v2122_v50  ;;  %v1172_v50 = vld [vmem:[%s2268_s8 + $0x8] sm:$0xff] }
 0x3b5   :  { %v883_v58 = vpop.f32.mrf.mxu3 }
 0x3b6   :  { %v1011_v60 = vpop.f32.mrf.mxu2 }
 0x3b7   :  { %v1096_v18 = vmul.f32 %v1011_v60, %v868_v46 }
 0x3b8   :  { %v1063_v42 = vpop.f32.mrf.mxu0 }
 0x3b9   :  { %v1118_v56 = vpack.c.bf16 %v1096_v18, %v1094_v63  ;;  %v1099_v20 = vmul.f32 %v1063_v42, %v920_v3  ;;  %v1200_v3 = vld [vmem:[%s2268_s8 + $0xe8] sm:$0xff]  ;;  %v1199_v42 = vld [vmem:[%s2268_s8 + $0xe0] sm:$0xff] }
 0x3be   :  { %v1014_v4 = vpop.f32.mrf.mxu2 }
 0x3bf   :  { %v1098_v24 = vmul.f32 %v1014_v4, %v871_v59  ;;  %v1379_v59 = vld [vmem:[%s2261_s1] ss:$0 sm:$0xff]  ;;  %v1543_v4 = vmov 1.0|1.0  }
 0x3c0   :  { %v1065_v14 = vpop.f32.mrf.mxu0 }
 0x3c6   :  { %v1016_v1 = vpop.f32.mrf.mxu2 }
 0x3c7   :  { %v1100_v36 = vmul.f32 %v1016_v1, %v873_v43  ;;  %v1201_v1 = vld [vmem:[%s2268_s8 + $0xf0] sm:$0xff] }
 0x3c8   :  { %v1068_v13 = vpop.f32.mrf.mxu0 }
 0x3c9   :  { %v1120_v45 = vpack.c.bf16 %v1100_v36, %v1098_v24  ;;  %v1103_v27 = vmul.f32 %v1068_v13, %v925_v7  ;;  %v1191_v7 = vld [vmem:[%s2268_s8 + $0xa0] sm:$0xff]  ;;  %v1190_v13 = vld [vmem:[%s2268_s8 + $0x98] sm:$0xff] }
 0x3ce   :  { %v1019_v31 = vpop.f32.mrf.mxu2 }
 0x3cf   :  { %v1102_v28 = vmul.f32 %v1019_v31, %v876_v33  ;;  %v1128_v33 = vshrl.u32 %v1127_v48, 7  ;;  %v1198_v31 = vld [vmem:[%s2268_s8 + $0xd8] sm:$0xff] }
 0x3d0   :  { %v1070_v39 = vpop.f32.mrf.mxu0 }
 0x3d1   :  { %vm1130_vm4 = vcmp.eq.s32.totalorder %v1128_v33, %v1379_v59 }
 0x3d2   :  { %vm2136_vm5 = vmpackc.low %vm1130_vm4, %vm1130_vm4 }
 0x3d6   :  { %v1021_v2 = vpop.f32.mrf.mxu2 }
 0x3d7   :  { %v1104_v17 = vmul.f32 %v1021_v2, %v878_v25  ;;  %v1197_v25 = vld [vmem:[%s2268_s8 + $0xd0] sm:$0xff]  ;;  %v1196_v2 = vld [vmem:[%s2268_s8 + $0xc8] sm:$0xff] }
 0x3d8   :  { %v1073_v47 = vpop.f32.mrf.mxu0 }
 0x3d9   :  { %v1122_v40 = vpack.c.bf16 %v1104_v17, %v1102_v28  ;;  %v1107_v63 = vmul.f32 %v1073_v47, %v930_v23 }
 0x3de   :  { %v1024_v57 = vpop.f32.mrf.mxu2 }
 0x3df   :  { %v1106_v19 = vmul.f32 %v1024_v57, %v881_v15  ;;  %v1193_v15 = vld [vmem:[%s2268_s8 + $0xb0] sm:$0xff]  ;;  %v1192_v57 = vld [vmem:[%s2268_s8 + $0xa8] sm:$0xff] }
 0x3e0   :  { %v1075_v51 = vpop.f32.mrf.mxu0 }
 0x3e1   :  { %v1109_v46 = vmul.f32 %v1075_v51, %v932_v49 }
 0x3e3   :  { %v1125_v60 = vpack.c.bf16 %v1109_v46, %v1107_v63 }
 0x3e6   :  { %v1026_v9 = vpop.f32.mrf.mxu2 }
 0x3e7   :  { %v1108_v30 = vmul.f32 %v1026_v9, %v883_v58  ;;  %v1189_v58 = vld [vmem:[%s2268_s8 + $0x90] sm:$0xff]  ;;  %v1188_v9 = vld [vmem:[%s2268_s8 + $0x88] sm:$0xff] }
 0x3e9   :  { %v1124_v38 = vpack.c.bf16 %v1108_v30, %v1106_v19  ;;  %v1187_v19 = vld [vmem:[%s2268_s8 + $0x80] sm:$0xff] }
 0x3eb   :  { %1136 = vmatpush.bf16.msra.mxu3 %v1124_v38 }
 0x3ef   :  { %1137 = vmatpush.bf16.msra.mxu3 %v1122_v40 }
 0x3f3   :  { %1138 = vmatpush.bf16.msra.mxu3 %v1120_v45 }
 0x3f7   :  { %1139 = vmatpush.bf16.msra.mxu3 %v1118_v56 }
 0x3fb   :  { %1140 = vmatpush.bf16.msra.mxu3 %v1116_v62  ;;  %v1105_v62 = vmul.f32 %v1070_v39, %v927_v37  ;;  %v1380_v39 = vld [vmem:[%s2269_s9] ss:$0 sm:$0xff] }
 0x3fd   :  { %v1123_v43 = vpack.c.bf16 %v1105_v62, %v1103_v27 }
 0x3ff   :  { %1141 = vmatpush.bf16.msra.mxu3 %v1114_v32  ;;  %v1101_v32 = vmul.f32 %v1065_v14, %v922_v5  ;;  %v1195_v5 = vld [vmem:[%s2268_s8 + $0xc0] sm:$0xff]  ;;  %v1194_v14 = vld [vmem:[%s2268_s8 + $0xb8] sm:$0xff] }
 0x403   :  { %1142 = vmatpush.bf16.msra.mxu3 %v1112_v35  ;;  %v1121_v35 = vpack.c.bf16 %v1101_v32, %v1099_v20 }
 0x407   :  { %1143 = vmatpush.bf16.msra.mxu3 %v1110_v53  ;;  %v1185_v53 = vld [vmem:[%s2268_s8 + $0x70] sm:$0xff] }
 0x40a   :  { %1365 = vmatmul.msk.bf16.vlgmr.msra.gmra.mxu3 %vm2136_vm5, %v1543_v4 }
 0x40b   :  { %1149 = vmatpush.bf16.msrb.mxu3 %v1125_v60 }
 0x40f   :  { %1150 = vmatpush.bf16.msrb.mxu3 %v1123_v43 }
 0x413   :  { %1151 = vmatpush.bf16.msrb.mxu3 %v1121_v35 }
 0x417   :  { %1152 = vmatpush.bf16.msrb.mxu3 %v1119_v41 }
 0x41b   :  { %1153 = vmatpush.bf16.msrb.mxu3 %v1117_v6  ;;  %v1173_v6 = vld [vmem:[%s2268_s8 + $0x10] sm:$0xff] }
 0x41f   :  { %1154 = vmatpush.bf16.msrb.mxu3 %v1115_v21  ;;  %v1176_v21 = vld [vmem:[%s2268_s8 + $0x28] sm:$0xff] }
 0x423   :  { %1155 = vmatpush.bf16.msrb.mxu3 %v1113_v22  ;;  %v1179_v22 = vld [vmem:[%s2268_s8 + $0x40] sm:$0xff] }
 0x427   :  { %1156 = vmatpush.bf16.msrb.mxu3 %v1111_v61  ;;  %v1180_v61 = vld [vmem:[%s2268_s8 + $0x48] sm:$0xff]  ;;  %s1258_s8 = sshll.u32 %s2270_s10, 4  ;;  %s1259_s8 = int_to_ptr.hbm [resolvable:$true] %s1258_s8 }
 0x42a   :  { %1367 = vmatmul.msk.bf16.vlgmr.msrb.gmra.mxu3 %vm2136_vm5, %v1543_v4 }
 0x42b   :  { %1207 = vmatpush.msra.mxu3 %v1186_v52 }
 0x42d   :  { %1208 = vmatpush.msra.mxu3 %v1185_v53 }
 0x42f   :  { %1209 = vmatpush.msra.mxu3 %v1184_v54 }
 0x431   :  { %1210 = vmatpush.msra.mxu3 %v1183_v10 }
 0x433   :  { %1211 = vmatpush.msra.mxu3 %v1182_v29 }
 0x435   :  { %1212 = vmatpush.msra.mxu3 %v1181_v55 }
 0x437   :  { %1213 = vmatpush.msra.mxu3 %v1180_v61 }
 0x439   :  { %1214 = vmatpush.msra.mxu3 %v1179_v22 }
 0x43b   :  { %1215 = vmatpush.msra.mxu3 %v1178_v11 }
 0x43d   :  { %1216 = vmatpush.msra.mxu3 %v1177_v16 }
 0x43f   :  { %1217 = vmatpush.msra.mxu3 %v1176_v21 }
 0x441   :  { %1218 = vmatpush.msra.mxu3 %v1175_v34 }
 0x443   :  { %1219 = vmatpush.msra.mxu3 %v1174_v44 }
 0x445   :  { %1220 = vmatpush.msra.mxu3 %v1173_v6 }
 0x447   :  { %1221 = vmatpush.msra.mxu3 %v1172_v50 }
 0x449   :  { %1222 = vmatpush.msra.mxu3 %v1171_v12 }
 0x44b   :  { %1227 = vmatpush.msrb.mxu3 %v1202_v0 }
 0x44d   :  { %1228 = vmatpush.msrb.mxu3 %v1201_v1 }
 0x44f   :  { %1229 = vmatpush.msrb.mxu3 %v1200_v3 }
 0x451   :  { %1230 = vmatpush.msrb.mxu3 %v1199_v42 }
 0x453   :  { %1231 = vmatpush.msrb.mxu3 %v1198_v31 }
 0x455   :  { %1232 = vmatpush.msrb.mxu3 %v1197_v25 }
 0x457   :  { %1233 = vmatpush.msrb.mxu3 %v1196_v2 }
 0x459   :  { %1234 = vmatpush.msrb.mxu3 %v1195_v5 }
 0x45b   :  { %1235 = vmatpush.msrb.mxu3 %v1194_v14 }
 0x45d   :  { %1236 = vmatpush.msrb.mxu3 %v1193_v15 }
 0x45f   :  { %1237 = vmatpush.msrb.mxu3 %v1192_v57 }
 0x461   :  { %1238 = vmatpush.msrb.mxu3 %v1191_v7 }
 0x463   :  { %1239 = vmatpush.msrb.mxu3 %v1190_v13 }
 0x465   :  { %1240 = vmatpush.msrb.mxu3 %v1189_v58 }
 0x467   :  { %1241 = vmatpush.msrb.mxu3 %v1188_v9 }
 0x469   :  { %1242 = vmatpush.msrb.mxu3 %v1187_v19 }
 0x48d   :  { %v1145_v30 = vpop.f32.mrf.mxu3 }
 0x48e   :  { %1223 = vmatmul.f32.vlgmr.msra.gmra.mxu3 %v1145_v30 }
 0x495   :  { %v1147_v17 = vpop.f32.mrf.mxu3 }
 0x4ad   :  { %v1158_v38 = vpop.f32.mrf.mxu3 }
 0x4ae   :  { %1243 = vmatmul.f32.vlgmr.msrb.gmra.mxu3 %v1158_v38 }
 0x4b5   :  { %v1160_v28 = vpop.f32.mrf.mxu3 }
 0x511   :  { %v1224_v37 = vpop.f32.mrf.mxu3 }
 0x512   :  { %v1225_v36 = vadd.f32 %v1380_v39, %v1224_v37 }
 0x531   :  { %v1244_v40 = vpop.f32.mrf.mxu3 }
 0x532   :  { %v1245_v24 = vadd.f32 %v1244_v40, %v1225_v36 }
 0x534   :  { %vm1247_vm6 = vcmp.gt.f32.partialorder %v1245_v24, 0.0  ;;  %v1248_v18 = vmul.f32 0.01, %v1245_v24 }
 0x536   :  { %v1249_v45 = vsel %vm1247_vm6, %v1245_v24, %v1248_v18 }
 0x537   :  { %1250 = vst.msk [vmem:[#allocation3] sm:$0xff] %vm75_vm0, %v1249_v45 }
 0x538   :  { %1261 = dma.vmem_to_hbm [thread:$0]  %s1257_s14, 128, %s1259_s8, [#allocation4]  }
 0x539   :  { %1541 = dma.done.wait [#allocation4], 128  }
 0x53a   :  { %1542 = vsyncadd [#allocation4], 4294967168 }
 0x53b   :  { %1266 = vsyncpa [#allocation4], 1 }

</bundles_post_ra>
